<compile_context>
chip_gen: v7x
topology: tpu7x:2x2x1
jax: 0.10.0
libtpu: 0.0.40
codegen_flags: <defaults>
</compile_context>

<pallas_src>
import jax
import jax.numpy as jnp
from jax.experimental import pallas as pl
from jax.experimental.pallas import tpu as pltpu

C_IN = 64
C_OUT = 64
KH = KW = 3


def conv_relu_kernel(x_ref, w_ref, o_ref):
    # x_ref: (BB, H+2, W+2, C_IN)  bf16  zero-padded NHWC input tile
    # w_ref: (KW*C_IN, KH*C_OUT)   bf16  kw folded into K, kh folded into N
    # o_ref: (BB, H, W, C_OUT)     f32
    bb, hp2, wp2, cin = x_ref.shape
    h, w = hp2 - 2, wp2 - 2
    cout = o_ref.shape[-1]

    x = x_ref[...]
    # kw-unfold in VMEM: xk[b, h', w', kw*Cin + c] = x[b, h', w' + kw, c].
    # The W-offset slices cost two sublane shifts (XLU/VPU have slack); the
    # lane concat builds the 192-wide contraction dim.
    xk = jnp.concatenate([x[:, :, kw:kw + w, :] for kw in range(KW)], axis=-1)
    patch = xk.reshape(bb * hp2 * w, KW * cin)   # pure view: W is a mult. of 8

    # Single MXU pass with 192-column fill.  Output column group kh holds the
    # kernel-row-kh contribution evaluated at every padded row h'.
    y = jnp.dot(patch, w_ref[...], preferred_element_type=jnp.float32)
    y = y.reshape(bb, hp2, w, KH * cout)

    # Combine kh taps with relayout-free major-dim (H) row shifts:
    #   out[h] = Y[h+0, grp0] + Y[h+1, grp1] + Y[h+2, grp2]
    out = (y[:, 0:h,     :, 0 * cout:1 * cout]
           + y[:, 1:1 + h, :, 1 * cout:2 * cout]
           + y[:, 2:2 + h, :, 2 * cout:3 * cout])

    o_ref[...] = jnp.maximum(out, 0.0).astype(o_ref.dtype)   # fused ReLU


def prepare_weight(weight_oihw):
    """OIHW (64,64,3,3) f32 -> (KW*C_IN, KH*C_OUT) bf16.  Run once per model.

    wk[kw*C_IN + c, kh*C_OUT + co] = weight[co, c, kh, kw]
    """
    assert weight_oihw.shape == (C_OUT, C_IN, KH, KW)
    wk = jnp.transpose(weight_oihw, (3, 1, 2, 0)).reshape(KW * C_IN, KH * C_OUT)
    return wk.astype(jnp.bfloat16)


def _pick_batch_block(n, h, w):
    """Images per grid step.

    Prefer >=4 grid steps (v7x: 2 TensorCores x >=2 pipelined steps each) as
    long as the per-step matmul M stays >= ~512 rows; otherwise take the
    largest block within a conservative VMEM row budget (v5e: serial grid,
    fewer/bigger steps amortize per-step overhead).
    """
    max_rows = 8192                      # keeps the f32 Y intermediate small

    def rows(d):
        return d * (h + 2) * w

    divisors = [d for d in range(1, n + 1) if n % d == 0]
    fitting = [d for d in divisors if rows(d) <= max_rows] or [1]
    ge4 = [d for d in fitting if n // d >= 4]
    if ge4 and rows(max(ge4)) >= 512:
        return max(ge4)
    return max(fitting)


@jax.jit
def conv_relu_block(x_nchw, wk):
    """ConvReLUBlock forward.

    x_nchw: (N, 64, H, W) float32 (PyTorch NCHW convention)
    wk:     prepare_weight(weight_oihw)  -- (192, 192) bf16
    returns (N, 64, H, W) float32
    """
    N, C, H, W = x_nchw.shape
    assert C == C_IN and wk.shape == (KW * C_IN, KH * C_OUT)

    # NCHW -> NHWC bf16 + zero-pad (padding=1): one fused slab write; the
    # kw-unfold now happens inside the kernel (in VMEM), not in HBM.
    # TODO(synk): in a full HiCNN stack keep activations NHWC/bf16 end-to-end
    # so the NCHW<->NHWC transposes happen once at model boundaries.
    x_pad = jnp.pad(
        jnp.transpose(x_nchw, (0, 2, 3, 1)).astype(jnp.bfloat16),
        ((0, 0), (1, 1), (1, 1), (0, 0)))

    BB = _pick_batch_block(N, H, W)
    # TODO(synk): for large feature maps add an H-tiling grid axis with a
    # +2-row halo so per-step tiles keep fitting v7x's 64 MiB VMEM.

    out_nhwc = pl.pallas_call(
        conv_relu_kernel,
        out_shape=jax.ShapeDtypeStruct((N, H, W, C_OUT), jnp.float32),
        grid_spec=pltpu.PrefetchScalarGridSpec(
            num_scalar_prefetch=0,
            grid=(N // BB,),
            in_specs=[
                pl.BlockSpec((BB, H + 2, W + 2, C_IN), lambda n: (n, 0, 0, 0)),
                # Constant index_map -> weight stays VMEM-resident across steps.
                pl.BlockSpec((KW * C_IN, KH * C_OUT), lambda n: (0, 0)),
            ],
            out_specs=pl.BlockSpec((BB, H, W, C_OUT), lambda n: (n, 0, 0, 0)),
        ),
        compiler_params=pltpu.CompilerParams(
            dimension_semantics=("parallel",),
            vmem_limit_bytes=32 * 1024 * 1024),
    )(x_pad, wk)

    # NHWC -> NCHW to match the PyTorch module's output convention.
    return jnp.transpose(out_nhwc, (0, 3, 1, 2))


if __name__ == "__main__":
    key = jax.random.PRNGKey(0)
    kx, kw_key = jax.random.split(key)

    # Small shapes consistent with the module (channels fixed at 64).
    N, H, W = 8, 16, 16
    x = jax.random.normal(kx, (N, C_IN, H, W), dtype=jnp.float32)
    weight = jax.random.normal(kw_key, (C_OUT, C_IN, KH, KW), dtype=jnp.float32)
    weight = weight * (2.0 / (C_IN * KH * KW)) ** 0.5

    wk = prepare_weight(weight)            # hoisted one-time weight reformat
    out = jax.block_until_ready(conv_relu_block(x, wk))

    # Reference: f32 conv + ReLU on bf16-rounded operands.  NOTE for users:
    # the kernel feeds the MXU bf16 operands with f32 accumulation, so results
    # deviate slightly from a pure-f32 PyTorch Conv2d.
    xr = x.astype(jnp.bfloat16).astype(jnp.float32)
    wr = weight.astype(jnp.bfloat16).astype(jnp.float32)
    ref = jax.lax.conv_general_dilated(
        xr, wr, window_strides=(1, 1), padding=((1, 1), (1, 1)),
        dimension_numbers=("NCHW", "OIHW", "NCHW"))
    ref = jnp.maximum(ref, 0.0)

    assert out.shape == (N, C_OUT, H, W)
    assert jnp.allclose(out, ref, rtol=1e-3, atol=1e-3), \
        float(jnp.max(jnp.abs(out - ref)))
    print("KERNEL_OK")
</pallas_src>

<mosaic_0001>
module attributes {stable_mosaic.version = 11 : i64} {
  func.func @conv_relu_kernel(%arg0: i32, %arg1: memref<2x18x18x64xbf16, #tpu.memory_space<vmem>>, %arg2: memref<192x192xbf16, #tpu.memory_space<vmem>>, %arg3: memref<2x16x16x64xf32, #tpu.memory_space<vmem>>) attributes {dimension_semantics = [#tpu.dimension_semantics<parallel>], iteration_bounds = array<i64: 4>, scalar_prefetch = 0 : i64, scratch_operands = 0 : i64, tpu.core_type = #tpu.core_type<tc>, window_params = [{transform_indices = @transform_0, window_bounds = array<i64: 2, 18, 18, 64>}, {pipeline_mode = #tpu.pipeline_mode<synchronous>, transform_indices = @transform_1, window_bounds = array<i64: 192, 192>}, {transform_indices = @transform_2, window_bounds = array<i64: 2, 16, 16, 64>}]} {
    %c0 = arith.constant 0 : index
    %c0_0 = arith.constant 0 : index
    %c0_1 = arith.constant 0 : index
    %c0_2 = arith.constant 0 : index
    %0 = vector.load %arg1[%c0, %c0_0, %c0_1, %c0_2] : memref<2x18x18x64xbf16, #tpu.memory_space<vmem>>, vector<2x18x18x64xbf16>
    %1 = vector.extract_strided_slice %0 {offsets = [0, 0, 0, 0], sizes = [2, 18, 16, 64], strides = [1, 1, 1, 1]} : vector<2x18x18x64xbf16> to vector<2x18x16x64xbf16>
    %2 = vector.extract_strided_slice %0 {offsets = [0, 0, 1, 0], sizes = [2, 18, 16, 64], strides = [1, 1, 1, 1]} : vector<2x18x18x64xbf16> to vector<2x18x16x64xbf16>
    %3 = vector.extract_strided_slice %0 {offsets = [0, 0, 2, 0], sizes = [2, 18, 16, 64], strides = [1, 1, 1, 1]} : vector<2x18x18x64xbf16> to vector<2x18x16x64xbf16>
    %4 = tpu.concatenate %1, %2, %3 in 3 : vector<2x18x16x64xbf16>, vector<2x18x16x64xbf16>, vector<2x18x16x64xbf16> -> vector<2x18x16x192xbf16>
    %5 = vector.shape_cast %4 : vector<2x18x16x192xbf16> to vector<576x192xbf16>
    %c0_3 = arith.constant 0 : index
    %c0_4 = arith.constant 0 : index
    %6 = vector.load %arg2[%c0_3, %c0_4] : memref<192x192xbf16, #tpu.memory_space<vmem>>, vector<192x192xbf16>
    %cst = arith.constant dense<0.000000e+00> : vector<576x192xf32>
    %7 = tpu.matmul %5, %6, %cst {dimension_numbers = #tpu.dot_dimension_numbers<[1], [0], [0], [1], [0, 0, 1, 1], [], []>} : vector<576x192xbf16>, vector<192x192xbf16>, vector<576x192xf32> -> vector<576x192xf32>
    %8 = vector.shape_cast %7 : vector<576x192xf32> to vector<2x18x16x192xf32>
    %9 = vector.extract_strided_slice %8 {offsets = [0, 0, 0, 0], sizes = [2, 16, 16, 64], strides = [1, 1, 1, 1]} : vector<2x18x16x192xf32> to vector<2x16x16x64xf32>
    %10 = vector.extract_strided_slice %8 {offsets = [0, 1, 0, 64], sizes = [2, 16, 16, 64], strides = [1, 1, 1, 1]} : vector<2x18x16x192xf32> to vector<2x16x16x64xf32>
    %11 = arith.addf %9, %10 : vector<2x16x16x64xf32>
    %12 = vector.extract_strided_slice %8 {offsets = [0, 2, 0, 128], sizes = [2, 16, 16, 64], strides = [1, 1, 1, 1]} : vector<2x18x16x192xf32> to vector<2x16x16x64xf32>
    %13 = arith.addf %11, %12 : vector<2x16x16x64xf32>
    %cst_5 = arith.constant 0.000000e+00 : f32
    %14 = vector.broadcast %cst_5 : f32 to vector<2x16x16x64xf32>
    %15 = arith.maximumf %13, %14 : vector<2x16x16x64xf32>
    %c0_6 = arith.constant 0 : index
    %c0_7 = arith.constant 0 : index
    %c0_8 = arith.constant 0 : index
    %c0_9 = arith.constant 0 : index
    %16 = vector.load %arg3[%c0_6, %c0_7, %c0_8, %c0_9] : memref<2x16x16x64xf32, #tpu.memory_space<vmem>>, vector<2x16x16x64xf32>
    tpu.vector_store %arg3[%c0_6, %c0_7, %c0_8, %c0_9], %15 {strides = array<i32>} : memref<2x16x16x64xf32, #tpu.memory_space<vmem>>, vector<2x16x16x64xf32>,
    return
  }
  func.func @transform_0(%arg0: i32) -> (i32, i32, i32, i32) {
    %c0_i32 = arith.constant 0 : i32
    %c0_i32_0 = arith.constant 0 : i32
    %c0_i32_1 = arith.constant 0 : i32
    %c0_i32_2 = arith.constant 0 : i32
    return %arg0, %c0_i32, %c0_i32_0, %c0_i32_1 : i32, i32, i32, i32
  }
  func.func @transform_1(%arg0: i32) -> (i32, i32) {
    %c0_i32 = arith.constant 0 : i32
    %c0_i32_0 = arith.constant 0 : i32
    %c0_i32_1 = arith.constant 0 : i32
    return %c0_i32, %c0_i32_0 : i32, i32
  }
  func.func @transform_2(%arg0: i32) -> (i32, i32, i32, i32) {
    %c0_i32 = arith.constant 0 : i32
    %c0_i32_0 = arith.constant 0 : i32
    %c0_i32_1 = arith.constant 0 : i32
    %c0_i32_2 = arith.constant 0 : i32
    return %arg0, %c0_i32, %c0_i32_0, %c0_i32_1 : i32, i32, i32, i32
  }
}

</mosaic_0001>

<bundles_post_ra>
// kernel: conv_relu_block.1
= control target key start
LH: loop header
LB: loop body
LE: loop exit
PB: predicated region body
PF: predicated region fallthrough
CT: control target
= control target key end

     0   :  { %7 = vsyncpa [#allocation3], 0  ;;  %s4332_s0 = inlined_call_operand.vmem [shape: bf16[8,18,18,64], index: 0, kind: input, shape index: {}]   ;;  %s4333_s1 = inlined_call_operand.vmem [shape: bf16[192,192], index: 1, kind: input, shape index: {}]   ;;  %s4334_s2 = inlined_call_operand.hbm [shape: f32[8,16,16,64], index: 2, kind: output, shape index: {}]  }
   0x1   :  { %9 = vsyncpa [#allocation3 + $0x1], 0  ;;  %s2901_s9 = smov 0   ;;  %s2903_s10 = smov 0  }
   0x2   :  { %s2905_s11 = smov 0   ;;  %s2907_s12 = smov 0  }
   0x3 LB: > { %s2922_s13 = sadd.s32 4294967295, %s2880_s12   ;;  %s2490_s14 = sadd.s32 4294967294, %s2880_s12   ;;  %s2880_s12 = sphi %s2907_s12, %s4581_s12   ;;  %s2876_s11 = sphi %s2905_s11, %s4580_s11   ;;  %s2872_s10 = sphi %s2903_s10, %s4579_s10   ;;  %s2868_s9 = sphi %s2901_s9, %s4578_s9  }
   0x4   : > { %s2926_s15 = sadd.s32 1, %s2880_s12   ;;  %s69_s16 = sadd.s32 1, %s2876_s11 }
   0x5   : > { %s66_s17 = ssub.s32 %s2880_s12, %s2926_s15  ;;  %p79_p0 = scmp.ne.s32.totalorder %s2876_s11, %s2872_s10 }
   0x6   : > { %p67_p1 = scmp.eq.s32.totalorder %s66_s17, 0  ;;  %p80_p2 = scmp.eq.s32.totalorder %s2922_s13, 3 }
   0x7   : > { %p85_p3 = scmp.ne.s32.totalorder %s2872_s10, %s2868_s9  ;;  %p86_p4 = scmp.eq.s32.totalorder %s2490_s14, 3 }
   0x8   : > { %s2937_s18 = scalar_select %p67_p1, %s2876_s11, %s69_s16  }
   0x9   : > { %p2939_p5 = por %p80_p2, %p79_p0  ;;  %p2943_p6 = por %p86_p4, %p85_p3 }
   0xa   : > { %p2493_p7 = scmp.ge.s32.totalorder %s2880_s12, 1  ;;  %p117_p8 = scmp.lt.s32.totalorder %s2880_s12, 5 }
   0xc   : > { %p118_p9 = pnand %p2493_p7, %p117_p8 }
   0xe   : > { %121 = sbr.rel (%p118_p9) target bundleno = 635 (0x27b), region = 28 }
  0x15   : > { %s2495_s21 = sshll.u32 %s2922_s13, 1  ;;  %v2738_v0 = vld [vmem:[%s4333_s1 + $0x4] ss:$8 sps:$4 sm:$0xff]   ;;  %v2742_v1 = vld [vmem:[%s4333_s1] ss:$8 sps:$4 sm:$0xff]   ;;  %s2882_s29 = smov 64  }
  0x16   : > { %p141_p10 = scmp.lt.s32.totalorder %s2495_s21, 7  ;;  %v2743_v2 = vld [vmem:[%s4333_s1 + $0x14] ss:$8 sps:$4 sm:$0xff]   ;;  %1520 = vmatprep.subr.bf16.mxu0 %v2738_v0  ;;  %2637 = vmatprep.subr.bf16.mxu1 %v2738_v0  ;;  %v2747_v3 = vld [vmem:[%s4333_s1 + $0x10] ss:$8 sps:$4 sm:$0xff]   ;;  %vm1050_vm1 = vcmask 1046528  }
  0x17   : > { %1521 = vmatpush1.bf16.msra.mxu0 %v2742_v1  ;;  %2649 = vmatpush1.bf16.msra.mxu1 %v2742_v1  ;;  %v2748_v4 = vld [vmem:[%s4333_s1 + $0x24] ss:$8 sps:$4 sm:$0xff]   ;;  %v2752_v5 = vld [vmem:[%s4333_s1 + $0x20] ss:$8 sps:$4 sm:$0xff]   ;;  %vm545_vm0 = vsmask.f32 7424 }
  0x18   : > { %s4583_s21 = smov (!%p141_p10, %s2495_s21), 7  ;;  %1522 = vmatprep.subr.bf16.mxu0 %v2743_v2  ;;  %2638 = vmatprep.subr.bf16.mxu1 %v2743_v2  ;;  %v2753_v6 = vld [vmem:[%s4333_s1 + $0x34] ss:$8 sps:$4 sm:$0xff]   ;;  %v2757_v10 = vld [vmem:[%s4333_s1 + $0x30] ss:$8 sps:$4 sm:$0xff]   ;;  %vm1159_vm2 = vcmask 523264  }
  0x19   : > { %s2661_s30 = smul.u32 216, %s4583_s21  ;;  %v2758_v15 = vld [vmem:[%s4333_s1 + $0x44] ss:$8 sps:$4 sm:$0xff]   ;;  %v2762_v24 = vld [vmem:[%s4333_s1 + $0x40] ss:$8 sps:$4 sm:$0xff]   ;;  %s2883_s28 = smov [#allocation2]  }
  0x1a   : > { %v2763_v30 = vld [vmem:[%s4333_s1 + $0x54] ss:$8 sps:$4 sm:$0xff]  }
  0x1b   : > { %s2971_s14 = scalar_lea.vmem %s4332_s0, %s2661_s30  ;;  %1523 = vmatpush1.bf16.msra.mxu0 %v2747_v3  ;;  %2650 = vmatpush1.bf16.msra.mxu1 %v2747_v3  ;;  %s2822_s30 = sshll.u32 %s2883_s28, 4  ;;  %s2823_s30 = int_to_ptr.vmem [resolvable:$false] %s2822_s30 }
  0x1c   : > { %v2977_v7 = vld [vmem:[%s2971_s14] sm:$0xff]   ;;  %v2980_v8 = vld [vmem:[%s2971_s14 + $0x8] ss:$0 sps:$4 sm:$0x11]   ;;  %1524 = vmatprep.subr.bf16.mxu0 %v2748_v4  ;;  %2639 = vmatprep.subr.bf16.mxu1 %v2748_v4  ;;  %v2983_v9 = vld [vmem:[%s2971_s14 + $0xd8] sm:$0xff]   ;;  %s2824_s3 = scalar_lea.vmem %s2823_s30, 16384 }
  0x1d   : > { %v547_v11 = vshrl.u32 %v2977_v7, 16  ;;  %v549_v12 = vshll.u32 %v2977_v7, 16  ;;  %v554_v13 = vshll.u32 %v2980_v8, 16  ;;  %v2992_v14 = vld [vmem:[%s2971_s14 + $0xe0] ss:$0 sps:$4 sm:$0x11]  }
  0x1e   : > { %v763_v16 = vshrl.u32 %v2983_v9, 16  ;;  %v765_v17 = vshll.u32 %v2983_v9, 16  ;;  %v770_v20 = vshll.u32 %v2992_v14, 16  ;;  %v3001_v21 = vld [vmem:[%s2971_s14 + $0xc] sm:$0xff]   ;;  %v3012_v29 = vld [vmem:[%s2971_s14 + $0xe4] sm:$0xff]   ;;  %v3025_v38 = vld [vmem:[%s2971_s14 + $0x18] sm:$0xff]  }
  0x1f   : > { %1525 = vmatpush1.bf16.msra.mxu0 %v2752_v5  ;;  %2651 = vmatpush1.bf16.msra.mxu1 %v2752_v5  ;;  %v551_v18 = vrot.slane %v549_v12, 1  ;;  %v556_v19 = vrot.slane %v554_v13, 1  ;;  %v3004_v23 = vld [vmem:[%s2971_s14 + $0x14] ss:$0 sps:$4 sm:$0x11]   ;;  %v559_v27 = vshrl.u32 %v3001_v21, 16 }
  0x20   : > { %1526 = vmatprep.subr.bf16.mxu0 %v2753_v6  ;;  %2640 = vmatprep.subr.bf16.mxu1 %v2753_v6  ;;  %v767_v22 = vrot.slane %v765_v17, 1  ;;  %v772_v26 = vrot.slane %v770_v20, 1  ;;  %v561_v28 = vshll.u32 %v3001_v21, 16  ;;  %v566_v32 = vshll.u32 %v3004_v23, 16  ;;  %v3036_v48 = vld [vmem:[%s2971_s14 + $0xf0] sm:$0xff]   ;;  %v3048_v56 = vld [vmem:[%s2971_s14 + $0x24] sm:$0xff]  }
  0x21   : > { %v552_v25 = vor.u32 %v551_v18, %v547_v11  ;;  %v3019_v33 = vld [vmem:[%s2971_s14 + $0xec] ss:$0 sps:$4 sm:$0x11]   ;;  %v775_v36 = vshrl.u32 %v3012_v29, 16  ;;  %v777_v37 = vshll.u32 %v3012_v29, 16  ;;  %v571_v45 = vshrl.u32 %v3025_v38, 16 }
  0x22   : > { %v768_v31 = vor.u32 %v767_v22, %v763_v16  ;;  %v563_v35 = vrot.slane %v561_v28, 1  ;;  %v568_v40 = vrot.slane %v566_v32, 1  ;;  %v782_v41 = vshll.u32 %v3019_v33, 16  ;;  %v3031_v44 = vld [vmem:[%s2971_s14 + $0x20] ss:$0 sps:$4 sm:$0x11]  }
  0x23   : > { %1527 = vmatpush1.bf16.msra.mxu0 %v2757_v10  ;;  %2652 = vmatpush1.bf16.msra.mxu1 %v2757_v10  ;;  %v557_v34 = vsel %vm545_vm0, %v552_v25, %v556_v19  ;;  %v779_v43 = vrot.slane %v777_v37, 1  ;;  %v573_v46 = vshll.u32 %v3025_v38, 16  ;;  %v578_v52 = vshll.u32 %v3031_v44, 16  ;;  %v3043_v53 = vld [vmem:[%s2971_s14 + $0xf8] ss:$0 sps:$4 sm:$0x11]  }
  0x24   : > { %1528 = vmatprep.subr.bf16.mxu0 %v2758_v15  ;;  %2641 = vmatprep.subr.bf16.mxu1 %v2758_v15  ;;  %v773_v39 = vsel %vm545_vm0, %v768_v31, %v772_v26  ;;  %v564_v42 = vor.u32 %v563_v35, %v559_v27  ;;  %v784_v47 = vrot.slane %v782_v41, 1  ;;  %v787_v54 = vshrl.u32 %v3036_v48, 16  ;;  %v3052_v60 = vld [vmem:[%s2971_s14 + $0xfc] sm:$0xff]   ;;  %v3056_v63 = vld [vmem:[%s2971_s14 + $0x2c] ss:$0 sps:$4 sm:$0x11]  }
  0x25   : > { %978 = vrot.lane.b32.xlu0 %v557_v34, %s2882_s29  ;;  %v780_v50 = vor.u32 %v779_v43, %v775_v36  ;;  %v575_v51 = vrot.slane %v573_v46, 1  ;;  %v789_v55 = vshll.u32 %v3036_v48, 16  ;;  %v580_v59 = vrot.slane %v578_v52, 1  ;;  %v3067_v11 = vld [vmem:[%s2971_s14 + $0x30] sm:$0xff]   ;;  %v3083_v31 = vld [vmem:[%s2971_s14 + $0x108] sm:$0xff]   ;;  %v3090_v34 = vld [vmem:[%s2971_s14 + $0x3c] sm:$0xff]  }
  0x26   : > { %v569_v49 = vsel %vm545_vm0, %v564_v42, %v568_v40  ;;  %v794_v62 = vshll.u32 %v3043_v53, 16  ;;  %v583_v0 = vshrl.u32 %v3048_v56, 16  ;;  %v585_v2 = vshll.u32 %v3048_v56, 16  ;;  %v3070_v13 = vld [vmem:[%s2971_s14 + $0x104] ss:$0 sps:$4 sm:$0x11]  }
  0x27   : > { %1529 = vmatpush1.bf16.msra.mxu0 %v2762_v24  ;;  %2653 = vmatpush1.bf16.msra.mxu1 %v2762_v24  ;;  %v785_v57 = vsel %vm545_vm0, %v780_v50, %v784_v47  ;;  %v576_v58 = vor.u32 %v575_v51, %v571_v45  ;;  %v791_v61 = vrot.slane %v789_v55, 1  ;;  %v799_v3 = vshrl.u32 %v3052_v60, 16  ;;  %v3075_v20 = vld [vmem:[%s2971_s14 + $0x38] ss:$0 sps:$4 sm:$0x11]  }
  0x28   : > { %1530 = vmatprep.subr.bf16.mxu0 %v2763_v30  ;;  %2642 = vmatprep.subr.bf16.mxu1 %v2763_v30  ;;  %v796_v5 = vrot.slane %v794_v62, 1  ;;  %v590_v6 = vshll.u32 %v3056_v63, 16  ;;  %v801_v10 = vshll.u32 %v3052_v60, 16  ;;  %v587_v12 = vrot.slane %v585_v2, 1  ;;  %v3104_v47 = vld [vmem:[%s2971_s14 + $0x114] sm:$0xff]  }
  0x29   : > { %1014 = vrot.lane.b32.xlu0 %v773_v39, %s2882_s29  ;;  %980 = vrot.lane.b32.xlu1 %v569_v49, %s2882_s29  ;;  %v581_v1 = vsel %vm545_vm0, %v576_v58, %v580_v59  ;;  %v792_v4 = vor.u32 %v791_v61, %v787_v54  ;;  %v806_v19 = vshll.u32 %v3070_v13, 16  ;;  %v595_v22 = vshrl.u32 %v3067_v11, 16  ;;  %v3087_v32 = vld [vmem:[%s2971_s14 + $0x110] ss:$0 sps:$4 sm:$0x11]   ;;  %v3114_v58 = vld [vmem:[%s2971_s14 + $0x48] sm:$0xff]  }
  0x2a   : > { %v592_v16 = vrot.slane %v590_v6, 1  ;;  %v803_v17 = vrot.slane %v801_v10, 1  ;;  %v588_v18 = vor.u32 %v587_v12, %v583_v0  ;;  %v597_v24 = vshll.u32 %v3067_v11, 16  ;;  %v3098_v42 = vld [vmem:[%s2971_s14 + $0x44] ss:$0 sps:$4 sm:$0x11]  }
  0x2b   : > { %v797_v15 = vsel %vm545_vm0, %v792_v4, %v796_v5  ;;  %v808_v27 = vrot.slane %v806_v19, 1  ;;  %v602_v30 = vshll.u32 %v3075_v20, 16  ;;  %v811_v39 = vshrl.u32 %v3083_v31, 16  ;;  %v3109_v52 = vld [vmem:[%s2971_s14 + $0x11c] ss:$0 sps:$4 sm:$0x11]  }
  0x2c   : > { %v804_v25 = vor.u32 %v803_v17, %v799_v3  ;;  %v593_v26 = vsel %vm545_vm0, %v588_v18, %v592_v16  ;;  %v599_v28 = vrot.slane %v597_v24, 1  ;;  %v813_v40 = vshll.u32 %v3083_v31, 16  ;;  %v3118_v2 = vld [vmem:[%s2971_s14 + $0x50] ss:$0 sps:$4 sm:$0x11]   ;;  %v3124_v10 = vld [vmem:[%s2971_s14 + $0x120] sm:$0xff]  }
  0x2d   : > { %1016 = vrot.lane.b32.xlu1 %v785_v57, %s2882_s29  ;;  %982 = vrot.lane.b32.xlu0 %v581_v1, %s2882_s29  ;;  %v604_v37 = vrot.slane %v602_v30, 1  ;;  %v818_v41 = vshll.u32 %v3087_v32, 16  ;;  %v607_v43 = vshrl.u32 %v3090_v34, 16  ;;  %v609_v46 = vshll.u32 %v3090_v34, 16  ;;  %v3136_v24 = vld [vmem:[%s2971_s14 + $0x54] sm:$0xff]  }
  0x2e   : > { %v809_v35 = vsel %vm545_vm0, %v804_v25, %v808_v27  ;;  %v600_v36 = vor.u32 %v599_v28, %v595_v22  ;;  %v815_v49 = vrot.slane %v813_v40, 1  ;;  %v614_v51 = vshll.u32 %v3098_v42, 16  ;;  %v3131_v18 = vld [vmem:[%s2971_s14 + $0x128] ss:$0 sps:$4 sm:$0x11]   ;;  %v3140_v28 = vld [vmem:[%s2971_s14 + $0x12c] sm:$0xff]  }
  0x2f   : > { %v820_v50 = vrot.slane %v818_v41, 1  ;;  %v611_v54 = vrot.slane %v609_v46, 1  ;;  %v823_v55 = vshrl.u32 %v3104_v47, 16  ;;  %v825_v57 = vshll.u32 %v3104_v47, 16 }
  0x30   : > { %v605_v45 = vsel %vm545_vm0, %v600_v36, %v604_v37  ;;  %v816_v59 = vor.u32 %v815_v49, %v811_v39  ;;  %v616_v61 = vrot.slane %v614_v51, 1  ;;  %v830_v62 = vshll.u32 %v3109_v52, 16  ;;  %v3144_v36 = vld [vmem:[%s2971_s14 + $0x5c] ss:$0 sps:$4 sm:$0x11]  }
  0x31   : > { %1018 = vrot.lane.b32.xlu1 %v797_v15, %s2882_s29  ;;  %984 = vrot.lane.b32.xlu0 %v593_v26, %s2882_s29  ;;  %v612_v0 = vor.u32 %v611_v54, %v607_v43  ;;  %v827_v1 = vrot.slane %v825_v57, 1  ;;  %v619_v3 = vshrl.u32 %v3114_v58, 16  ;;  %v621_v4 = vshll.u32 %v3114_v58, 16  ;;  %v3158_v54 = vld [vmem:[%s2971_s14 + $0x134] ss:$0 sps:$4 sm:$0x11]  }
  0x32   : > { %v821_v5 = vsel %vm545_vm0, %v816_v59, %v820_v50  ;;  %v832_v6 = vrot.slane %v830_v62, 1  ;;  %v626_v17 = vshll.u32 %v3118_v2, 16  ;;  %v835_v19 = vshrl.u32 %v3124_v10, 16  ;;  %v3155_v50 = vld [vmem:[%s2971_s14 + $0x60] sm:$0xff]  }
  0x33   : > { %v617_v12 = vsel %vm545_vm0, %v612_v0, %v616_v61  ;;  %v828_v15 = vor.u32 %v827_v1, %v823_v55  ;;  %v623_v16 = vrot.slane %v621_v4, 1  ;;  %v837_v22 = vshll.u32 %v3124_v10, 16  ;;  %v3164_v0 = vld [vmem:[%s2971_s14 + $0x68] ss:$0 sps:$4 sm:$0x11]  }
  0x34   : > { %v628_v27 = vrot.slane %v626_v17, 1  ;;  %v631_v37 = vshrl.u32 %v3136_v24, 16  ;;  %v633_v40 = vshll.u32 %v3136_v24, 16  ;;  %v847_v41 = vshrl.u32 %v3140_v28, 16 }
  0x35   : > { %1020 = vrot.lane.b32.xlu1 %v809_v35, %s2882_s29  ;;  %986 = vrot.lane.b32.xlu0 %v605_v45, %s2882_s29  ;;  %v833_v25 = vsel %vm545_vm0, %v828_v15, %v832_v6  ;;  %v624_v26 = vor.u32 %v623_v16, %v619_v3  ;;  %v839_v30 = vrot.slane %v837_v22, 1  ;;  %v842_v35 = vshll.u32 %v3131_v18, 16  ;;  %v3171_v16 = vld [vmem:[%s2971_s14 + $0x138] sm:$0xff]   ;;  %v3175_v17 = vld [vmem:[%s2971_s14 + $0x140] ss:$0 sps:$4 sm:$0x11]  }
  0x36   : > { %v638_v46 = vshll.u32 %v3144_v36, 16  ;;  %v849_v49 = vshll.u32 %v3140_v28, 16  ;;  %v635_v51 = vrot.slane %v633_v40, 1  ;;  %v854_v62 = vshll.u32 %v3158_v54, 16 }
  0x37   : > { %v629_v39 = vsel %vm545_vm0, %v624_v26, %v628_v27  ;;  %v840_v43 = vor.u32 %v839_v30, %v835_v19  ;;  %v844_v45 = vrot.slane %v842_v35, 1  ;;  %v643_v1 = vshrl.u32 %v3155_v50, 16  ;;  %v3178_v19 = vld [vmem:[%s2971_s14 + $0x6c] sm:$0xff]  }
  0x38   : > { %v640_v57 = vrot.slane %v638_v46, 1  ;;  %v851_v59 = vrot.slane %v849_v49, 1  ;;  %v636_v61 = vor.u32 %v635_v51, %v631_v37  ;;  %v645_v3 = vshll.u32 %v3155_v50, 16  ;;  %v3186_v37 = vld [vmem:[%s2971_s14 + $0x74] ss:$0 sps:$4 sm:$0x11]  }
  0x39   : > { %1022 = vrot.lane.b32.xlu1 %v821_v5, %s2882_s29  ;;  %988 = vrot.lane.b32.xlu0 %v617_v12, %s2882_s29  ;;  %v845_v55 = vsel %vm545_vm0, %v840_v43, %v844_v45  ;;  %v856_v6 = vrot.slane %v854_v62, 1  ;;  %v650_v15 = vshll.u32 %v3164_v0, 16  ;;  %v859_v27 = vshrl.u32 %v3171_v16, 16  ;;  %v3192_v43 = vld [vmem:[%s2971_s14 + $0x144] sm:$0xff]  }
  0x3a   : > { %v852_v4 = vor.u32 %v851_v59, %v847_v41  ;;  %v641_v5 = vsel %vm545_vm0, %v636_v61, %v640_v57  ;;  %v647_v12 = vrot.slane %v645_v3, 1  ;;  %v861_v30 = vshll.u32 %v3171_v16, 16  ;;  %v3197_v51 = vld [vmem:[%s2971_s14 + $0x14c] ss:$0 sps:$4 sm:$0x11]   ;;  %v3202_v61 = vld [vmem:[%s2971_s14 + $0x78] sm:$0xff]  }
  0x3b   : > { %v652_v26 = vrot.slane %v650_v15, 1  ;;  %v866_v35 = vshll.u32 %v3175_v17, 16  ;;  %v657_v41 = vshll.u32 %v3178_v19, 16  ;;  %v662_v49 = vshll.u32 %v3186_v37, 16 }
  0x3c   : > { %v857_v22 = vsel %vm545_vm0, %v852_v4, %v856_v6  ;;  %v863_v45 = vrot.slane %v861_v30, 1  ;;  %v871_v57 = vshrl.u32 %v3192_v43, 16  ;;  %v873_v59 = vshll.u32 %v3192_v43, 16  ;;  %v3206_v6 = vld [vmem:[%s2971_s14 + $0x80] ss:$0 sps:$4 sm:$0x11]  }
  0x3d   : > { %1024 = vrot.lane.b32.xlu1 %v833_v25, %s2882_s29  ;;  %990 = vrot.lane.b32.xlu0 %v629_v39, %s2882_s29  ;;  %v648_v25 = vor.u32 %v647_v12, %v643_v1  ;;  %v655_v39 = vshrl.u32 %v3178_v19, 16  ;;  %v868_v46 = vrot.slane %v866_v35, 1  ;;  %v664_v1 = vrot.slane %v662_v49, 1 }
  0x3e   : > { %v864_v62 = vor.u32 %v863_v45, %v859_v27  ;;  %v878_v3 = vshll.u32 %v3197_v51, 16  ;;  %v667_v12 = vshrl.u32 %v3202_v61, 16  ;;  %v669_v15 = vshll.u32 %v3202_v61, 16 }
  0x3f   : > { %v653_v40 = vsel %vm545_vm0, %v648_v25, %v652_v26  ;;  %v3212_v26 = vld [vmem:[%s2971_s14 + $0x150] sm:$0xff]  }
  0x40   : > { %v880_v25 = vrot.slane %v878_v3, 1  ;;  %v671_v35 = vrot.slane %v669_v15, 1  ;;  %v885_v45 = vshll.u32 %v3212_v26, 16  ;;  %v2768_v15 = vld [vmem:[%s4333_s1 + $0x64] ss:$8 sps:$4 sm:$0xff]  }
  0x41   : > { %1026 = vrot.lane.b32.xlu1 %v845_v55, %s2882_s29  ;;  %992 = vrot.lane.b32.xlu0 %v641_v5, %s2882_s29  ;;  %v659_v55 = vrot.slane %v657_v41, 1  ;;  %v875_v5 = vrot.slane %v873_v59, 1  ;;  %v883_v41 = vshrl.u32 %v3212_v26, 16 }
  0x43   : > { %v660_v4 = vor.u32 %v659_v55, %v655_v39  ;;  %v876_v30 = vor.u32 %v875_v5, %v871_v57  ;;  %v674_v39 = vshll.u32 %v3206_v6, 16  ;;  %v672_v55 = vor.u32 %v671_v35, %v667_v12  ;;  %v2767_v12 = vld [vmem:[%s4333_s1 + $0x50] ss:$8 sps:$4 sm:$0xff]   ;;  %v3244_v35 = vld [vmem:[%s2971_s14 + $0x15c] sm:$0xff]  }
  0x44   : > { %1531 = vmatpush1.bf16.msra.mxu0 %v2767_v12  ;;  %4407 = vst [vmem:[#allocation6_spill] sm:$0xff] %v3244_v35  ;;  %2654 = vmatpush1.bf16.msra.mxu1 %v2767_v12 }
  0x45   : > { %1028 = vrot.lane.b32.xlu1 %v857_v22, %s2882_s29  ;;  %994 = vrot.lane.b32.xlu0 %v653_v40, %s2882_s29  ;;  %v869_v22 = vsel %vm545_vm0, %v864_v62, %v868_v46  ;;  %v665_v27 = vsel %vm545_vm0, %v660_v4, %v664_v1  ;;  %v3219_v40 = vld [vmem:[%s2971_s14 + $0x158] ss:$0 sps:$4 sm:$0x11]   ;;  %v3224_v46 = vld [vmem:[%s2971_s14 + $0x84] sm:$0xff]   ;;  %v881_v49 = vsel %vm545_vm0, %v876_v30, %v880_v25  ;;  %v676_v59 = vrot.slane %v674_v39, 1 }
  0x46   : > { %v887_v62 = vrot.slane %v885_v45, 1  ;;  %v890_v57 = vshll.u32 %v3219_v40, 16  ;;  %v3229_v1 = vld [vmem:[%s2971_s14 + $0x8c] ss:$0 sps:$4 sm:$0x11]   ;;  %v679_v3 = vshrl.u32 %v3224_v46, 16  ;;  %1532 = vmatprep.subr.bf16.mxu0 %v2768_v15  ;;  %2643 = vmatprep.subr.bf16.mxu1 %v2768_v15 }
  0x47   : > { %4406 = vst [vmem:[#allocation5_spill] sm:$0xff] %v3229_v1  ;;  %v677_v4 = vsel %vm545_vm0, %v672_v55, %v676_v59  ;;  %v681_v5 = vshll.u32 %v3224_v46, 16  ;;  %v2772_v39 = vld [vmem:[%s4333_s1 + $0x60] ss:$8 sps:$4 sm:$0xff]   ;;  %v895_v59 = vshrl.u32 %v3244_v35, 16 }
  0x48   : > { %v892_v25 = vrot.slane %v890_v57, 1  ;;  %v3251_v55 = vld [vmem:[%s2971_s14 + $0x164] ss:$0 sps:$4 sm:$0x11]   ;;  %v2773_v57 = vld [vmem:[%s4333_s1 + $0x74] ss:$8 sps:$4 sm:$0xff]   ;;  %1533 = vmatpush1.bf16.msra.mxu0 %v2772_v39  ;;  %2655 = vmatpush1.bf16.msra.mxu1 %v2772_v39 }
  0x49   : > { %1030 = vrot.lane.b32.xlu1 %v869_v22, %s2882_s29  ;;  %996 = vrot.lane.b32.xlu0 %v665_v27, %s2882_s29  ;;  %v888_v22 = vor.u32 %v887_v62, %v883_v41  ;;  %v686_v27 = vshll.u32 %v3229_v1, 16  ;;  %v683_v30 = vrot.slane %v681_v5, 1  ;;  %4408 = vst [vmem:[#allocation7_spill] sm:$0xff] %v3251_v55  ;;  %v897_v62 = vshll.u32 %v3244_v35, 16  ;;  %v3261_v5 = vld [vmem:[%s2971_s14 + $0x90] sm:$0xff]  }
  0x4a   : > { %4409 = vst [vmem:[#allocation8_spill] sm:$0xff] %v3261_v5  ;;  %v3265_v15 = vld [vmem:[%s2971_s14 + $0x98] ss:$0 sps:$4 sm:$0x11]   ;;  %1534 = vmatprep.subr.bf16.mxu0 %v2773_v57  ;;  %2644 = vmatprep.subr.bf16.mxu1 %v2773_v57  ;;  %v2778_v39 = vld [vmem:[%s4333_s1 + $0x84] ss:$8 sps:$4 sm:$0xff]  }
  0x4b   : > { %v893_v45 = vsel %vm545_vm0, %v888_v22, %v892_v25  ;;  %v684_v41 = vor.u32 %v683_v30, %v679_v3  ;;  %v899_v22 = vrot.slane %v897_v62, 1  ;;  %4410 = vst [vmem:[#allocation9_spill] sm:$0xff] %v3265_v15  ;;  %v2777_v3 = vld [vmem:[%s4333_s1 + $0x70] ss:$8 sps:$4 sm:$0xff]   ;;  %v693_v30 = vshll.u32 %v3261_v5, 16 }
  0x4c   : > { %1535 = vmatpush1.bf16.msra.mxu0 %v2777_v3  ;;  %2656 = vmatpush1.bf16.msra.mxu1 %v2777_v3 }
  0x4d   : > { %1032 = vrot.lane.b32.xlu1 %v881_v49, %s2882_s29  ;;  %998 = vrot.lane.b32.xlu0 %v677_v4, %s2882_s29  ;;  %v688_v49 = vrot.slane %v686_v27, 1  ;;  %v902_v4 = vshll.u32 %v3251_v55, 16  ;;  %v691_v27 = vshrl.u32 %v3261_v5, 16  ;;  %v695_v62 = vrot.slane %v693_v30, 1 }
  0x4e   : > { %v3283_v5 = vld [vmem:[%s2971_s14 + $0x170] ss:$0 sps:$4 sm:$0x11]   ;;  %1536 = vmatprep.subr.bf16.mxu0 %v2778_v39  ;;  %2645 = vmatprep.subr.bf16.mxu1 %v2778_v39  ;;  %v2788_v39 = vld [vmem:[%s4333_s1 + $0xa4] ss:$8 sps:$4 sm:$0xff]  }
  0x4f   : > { %v689_v12 = vsel %vm545_vm0, %v684_v41, %v688_v49  ;;  %v904_v25 = vrot.slane %v902_v4, 1  ;;  %v900_v49 = vor.u32 %v899_v22, %v895_v59  ;;  %v698_v41 = vshll.u32 %v3265_v15, 16  ;;  %4412 = vst [vmem:[#allocation11_spill] sm:$0xff] %v3283_v5  ;;  %v2782_v22 = vld [vmem:[%s4333_s1 + $0x80] ss:$8 sps:$4 sm:$0xff]   ;;  %v3313_v15 = vld [vmem:[%s2971_s14 + $0x174] sm:$0xff]  }
  0x50   : > { %v696_v57 = vor.u32 %v695_v62, %v691_v27  ;;  %v2787_v27 = vld [vmem:[%s4333_s1 + $0x90] ss:$8 sps:$4 sm:$0xff]   ;;  %1537 = vmatpush1.bf16.msra.mxu0 %v2782_v22  ;;  %2657 = vmatpush1.bf16.msra.mxu1 %v2782_v22  ;;  %4415 = vst [vmem:[#allocation14_spill] sm:$0xff] %v3313_v15  ;;  %v921_v22 = vshll.u32 %v3313_v15, 16 }
  0x51   : > { %1034 = vrot.lane.b32.xlu1 %v893_v45, %s2882_s29  ;;  %1000 = vrot.lane.b32.xlu0 %v689_v12, %s2882_s29  ;;  %v3274_v45 = vld [vmem:[%s2971_s14 + $0x168] sm:$0xff]   ;;  %v905_v4 = vsel %vm545_vm0, %v900_v49, %v904_v25  ;;  %v700_v55 = vrot.slane %v698_v41, 1  ;;  %v2783_v25 = vld [vmem:[%s4333_s1 + $0x94] ss:$8 sps:$4 sm:$0xff]   ;;  %v914_v49 = vshll.u32 %v3283_v5, 16 }
  0x52   : > { %4411 = vst [vmem:[#allocation10_spill] sm:$0xff] %v3274_v45  ;;  %v907_v12 = vshrl.u32 %v3274_v45, 16  ;;  %v909_v59 = vshll.u32 %v3274_v45, 16  ;;  %v3296_v41 = vld [vmem:[%s2971_s14 + $0x9c] sm:$0xff]   ;;  %1538 = vmatprep.subr.bf16.mxu0 %v2783_v25  ;;  %2646 = vmatprep.subr.bf16.mxu1 %v2783_v25  ;;  %v1052_v25 = vrot.slane %v2980_v8, 1 }
  0x53   : > { %v701_v3 = vsel %vm545_vm0, %v696_v57, %v700_v55  ;;  %4413 = vst [vmem:[#allocation12_spill] sm:$0xff] %v3296_v41  ;;  %v916_v45 = vrot.slane %v914_v49, 1  ;;  %v1051_v55 = vrot.slane %v2977_v7, 1  ;;  %v705_v57 = vshll.u32 %v3296_v41, 16 }
  0x54   : > { %v911_v30 = vrot.slane %v909_v59, 1  ;;  %v703_v59 = vshrl.u32 %v3296_v41, 16  ;;  %1539 = vmatpush1.bf16.msra.mxu0 %v2787_v27  ;;  %2658 = vmatpush1.bf16.msra.mxu1 %v2787_v27  ;;  %v3334_v41 = vld [vmem:[%s2971_s14 + $0xb0] ss:$0 sps:$4 sm:$0x11]  }
  0x55   : > { %1036 = vrot.lane.b32.xlu1 %v905_v4, %s2882_s29  ;;  %v3299_v4 = vld [vmem:[%s2971_s14 + $0xa4] ss:$0 sps:$4 sm:$0x11]   ;;  %1002 = vrot.lane.b32.xlu0 %v701_v3, %s2882_s29  ;;  %v707_v7 = vrot.slane %v705_v57, 1  ;;  %v923_v57 = vrot.slane %v921_v22, 1 }
  0x56   : > { %4414 = vst [vmem:[#allocation13_spill] sm:$0xff] %v3299_v4  ;;  %v912_v62 = vor.u32 %v911_v30, %v907_v12  ;;  %v710_v5 = vshll.u32 %v3299_v4, 16  ;;  %v2792_v30 = vld [vmem:[%s4333_s1 + $0xa0] ss:$8 sps:$4 sm:$0xff]   ;;  %v919_v4 = vshrl.u32 %v3313_v15, 16  ;;  %1540 = vmatprep.subr.bf16.mxu0 %v2788_v39  ;;  %2647 = vmatprep.subr.bf16.mxu1 %v2788_v39  ;;  %v1053_v15 = vsel %vm1050_vm1, %v1051_v55, %v1052_v25 }
  0x57   : > { %v3321_v3 = vld [vmem:[%s2971_s14 + $0x17c] ss:$0 sps:$4 sm:$0x11]   ;;  %v2797_v27 = vld [vmem:[%s4333_s1 + $0xb0] ss:$8 sps:$4 sm:$0xff]   ;;  %2593 = vmatprep.mubr.msk.bf16.mxu0 %vm1159_vm2, %v1053_v15  ;;  %v3345_v39 = vld [vmem:[%s2971_s14 + $0x180] sm:$0xff]  }
  0x58   : > { %v917_v12 = vsel %vm545_vm0, %v912_v62, %v916_v45  ;;  %v712_v49 = vrot.slane %v710_v5, 1  ;;  %v2793_v45 = vld [vmem:[%s4333_s1 + $0xb4] ss:$8 sps:$4 sm:$0xff]   ;;  %v708_v62 = vor.u32 %v707_v7, %v703_v59  ;;  %v3331_v5 = vld [vmem:[%s2971_s14 + $0xa8] sm:$0xff]   ;;  %4416 = vst [vmem:[#allocation15_spill] sm:$0xff] %v3345_v39  ;;  %v924_v55 = vor.u32 %v923_v57, %v919_v4  ;;  %1541 = vmatpush1.bf16.msra.mxu0 %v2792_v30 }
  0x59   : > { %1038 = vrot.lane.b32.xlu1 %v917_v12, %s2882_s29  ;;  %v926_v12 = vshll.u32 %v3321_v3, 16  ;;  %v715_v8 = vshrl.u32 %v3331_v5, 16  ;;  %v717_v59 = vshll.u32 %v3331_v5, 16  ;;  %v722_v7 = vshll.u32 %v3334_v41, 16  ;;  %1542 = vmatprep.subr.bf16.mxu0 %v2793_v45  ;;  %v3357_v4 = vld [vmem:[%s2971_s14 + $0xb4] sm:$0xff]  }
  0x5a   : > { %v713_v35 = vsel %vm545_vm0, %v708_v62, %v712_v49  ;;  %v1105_v49 = vrot.slane %v2983_v9, 1  ;;  %2659 = vmatpush1.bf16.msra.mxu1 %v2792_v30  ;;  %v3351_v25 = vld [vmem:[%s2971_s14 + $0x188] ss:$0 sps:$4 sm:$0x11]   ;;  %4418 = vst [vmem:[#allocation17_spill] sm:$0xff] %v3357_v4  ;;  %v1106_v30 = vrot.slane %v2992_v14, 1 }
  0x5b   : > { %v928_v1 = vrot.slane %v926_v12, 1  ;;  %1004 = vrot.lane.b32.xlu0 %v713_v35, %s2882_s29  ;;  %v719_v22 = vrot.slane %v717_v59, 1  ;;  %4417 = vst [vmem:[#allocation16_spill] sm:$0xff] %v3351_v25  ;;  %v724_v15 = vrot.slane %v722_v7, 1  ;;  %2648 = vmatprep.subr.bf16.mxu1 %v2793_v45  ;;  %v931_v12 = vshrl.u32 %v3345_v39, 16 }
  0x5c   : > { %v933_v35 = vshll.u32 %v3345_v39, 16  ;;  %v938_v9 = vshll.u32 %v3351_v25, 16  ;;  %1543 = vmatpush1.bf16.msra.mxu0 %v2797_v27  ;;  %v3363_v59 = vld [vmem:[%s2971_s14 + $0xbc] ss:$0 sps:$4 sm:$0x11]   ;;  %v727_v45 = vshrl.u32 %v3357_v4, 16 }
  0x5d   : > { %v929_v62 = vsel %vm545_vm0, %v924_v55, %v928_v1  ;;  %v720_v57 = vor.u32 %v719_v22, %v715_v8  ;;  %v729_v55 = vshll.u32 %v3357_v4, 16  ;;  %v1107_v8 = vsel %vm1050_vm1, %v1105_v49, %v1106_v30  ;;  %v3376_v25 = vld [vmem:[%s2971_s14 + $0x194] ss:$0 sps:$4 sm:$0x11]   ;;  %v3379_v4 = vld [vmem:[%s2971_s14 + $0xc0] sm:$0xff]   ;;  %v3387_v30 = vld [vmem:[%s2971_s14 + $0x198] sm:$0xff]  }
  0x5e   : > { %1040 = vrot.lane.b32.xlu1 %v929_v62, %s2882_s29  ;;  %v935_v1 = vrot.slane %v933_v35, 1  ;;  %v940_v39 = vrot.slane %v938_v9, 1  ;;  %2660 = vmatpush1.bf16.msra.mxu1 %v2797_v27  ;;  %v734_v62 = vshll.u32 %v3363_v59, 16  ;;  %v3373_v35 = vld [vmem:[%s2971_s14 + $0x18c] sm:$0xff]   ;;  %4420 = vst [vmem:[#allocation19_spill] sm:$0xff] %v3376_v25  ;;  %4421 = vst [vmem:[#allocation20_spill] sm:$0xff] %v3379_v4 }
  0x5f   : > { %v725_v7 = vsel %vm545_vm0, %v720_v57, %v724_v15  ;;  %2611 = vmatprep.mubr.msk.bf16.mxu1 %vm1159_vm2, %v1107_v8  ;;  %v731_v22 = vrot.slane %v729_v55, 1  ;;  %4419 = vst [vmem:[#allocation18_spill] sm:$0xff] %v3373_v35  ;;  %v945_v57 = vshll.u32 %v3373_v35, 16  ;;  %v950_v9 = vshll.u32 %v3376_v25, 16  ;;  %4422 = vst [vmem:[#allocation21_spill] sm:$0xff] %v3387_v30 }
  0x60   : > { %1006 = vrot.lane.b32.xlu0 %v725_v7, %s2882_s29  ;;  %v936_v14 = vor.u32 %v935_v1, %v931_v12  ;;  %v736_v49 = vrot.slane %v734_v62, 1  ;;  %v943_v12 = vshrl.u32 %v3373_v35, 16  ;;  %v3391_v55 = vld [vmem:[%s2971_s14 + $0xc8] ss:$0 sps:$4 sm:$0x11]   ;;  %v739_v7 = vshrl.u32 %v3379_v4, 16 }
  0x61   : > { %v732_v15 = vor.u32 %v731_v22, %v727_v45  ;;  %4423 = vst [vmem:[#allocation22_spill] sm:$0xff] %v3391_v55  ;;  %v947_v45 = vrot.slane %v945_v57, 1  ;;  %v952_v8 = vrot.slane %v950_v9, 1  ;;  %v746_v22 = vshll.u32 %v3391_v55, 16 }
  0x62   : > { %v941_v27 = vsel %vm545_vm0, %v936_v14, %v940_v39  ;;  %v741_v39 = vshll.u32 %v3379_v4, 16 }
  0x63   : > { %1042 = vrot.lane.b32.xlu1 %v941_v27, %s2882_s29  ;;  %v737_v1 = vsel %vm545_vm0, %v732_v15, %v736_v49  ;;  %v948_v62 = vor.u32 %v947_v45, %v943_v12  ;;  %v3398_v27 = vld [vmem:[%s2971_s14 + $0x1a0] ss:$0 sps:$4 sm:$0x11]   ;;  %v955_v15 = vshrl.u32 %v3387_v30, 16  ;;  %v957_v49 = vshll.u32 %v3387_v30, 16 }
  0x64   : > { %1008 = vrot.lane.b32.xlu0 %v737_v1, %s2882_s29  ;;  %v743_v14 = vrot.slane %v741_v39, 1  ;;  %4424 = vst [vmem:[#allocation23_spill] sm:$0xff] %v3398_v27  ;;  %v748_v35 = vrot.slane %v746_v22, 1  ;;  %v962_v9 = vshll.u32 %v3398_v27, 16  ;;  %v1108_v27 = vrot.slane %v3012_v29, 1 }
  0x65   : > { %v953_v4 = vsel %vm545_vm0, %v948_v62, %v952_v8  ;;  %v959_v57 = vrot.slane %v957_v49, 1  ;;  %v3416_v8 = vld [vmem:[%s2971_s14 + $0xd4] ss:$0 sps:$4 sm:$0x11]   ;;  %v1109_v30 = vrot.slane %v3019_v33, 1 }
  0x66   : > { %v744_v25 = vor.u32 %v743_v14, %v739_v7  ;;  %v964_v39 = vrot.slane %v962_v9, 1  ;;  %v3410_v7 = vld [vmem:[%s2971_s14 + $0xcc] sm:$0xff]   ;;  %v3413_v14 = vld [vmem:[%s2971_s14 + $0x1a4] sm:$0xff]  }
  0x67   : > { %1044 = vrot.lane.b32.xlu1 %v953_v4, %s2882_s29  ;;  %v960_v1 = vor.u32 %v959_v57, %v955_v15  ;;  %4425 = vst [vmem:[#allocation24_spill] sm:$0xff] %v3410_v7  ;;  %4426 = vst [vmem:[#allocation25_spill] sm:$0xff] %v3413_v14  ;;  %v753_v22 = vshll.u32 %v3410_v7, 16  ;;  %v1054_v4 = vrot.slane %v3001_v21, 1  ;;  %v969_v62 = vshll.u32 %v3413_v14, 16 }
  0x68   : > { %v749_v12 = vsel %vm545_vm0, %v744_v25, %v748_v35  ;;  %v1055_v25 = vrot.slane %v3004_v23, 1  ;;  %v3422_v35 = vld [vmem:[%s2971_s14 + $0x1ac] ss:$0 sps:$4 sm:$0x11]   ;;  %v751_v15 = vshrl.u32 %v3410_v7, 16  ;;  %v758_v57 = vshll.u32 %v3416_v8, 16 }
  0x69   : > { %1010 = vrot.lane.b32.xlu0 %v749_v12, %s2882_s29  ;;  %v965_v45 = vsel %vm545_vm0, %v960_v1, %v964_v39  ;;  %v755_v49 = vrot.slane %v753_v22, 1  ;;  %v967_v9 = vshrl.u32 %v3413_v14, 16  ;;  %v971_v12 = vrot.slane %v969_v62, 1  ;;  %v2812_v7 = vld [vmem:[%s2971_s14] sm:$0xff]  }
  0x6a   : > { %v760_v39 = vrot.slane %v758_v57, 1  ;;  %v1056_v23 = vsel %vm1050_vm1, %v1054_v4, %v1055_v25  ;;  %v1110_v33 = vsel %vm1050_vm1, %v1108_v27, %v1109_v30  ;;  %v1111_v30 = vrot.slane %v3036_v48, 1 }
  0x6b   : > { %1046 = vrot.lane.b32.xlu1 %v965_v45, %s2882_s29  ;;  %v756_v1 = vor.u32 %v755_v49, %v751_v15  ;;  %v974_v45 = vshll.u32 %v3422_v35, 16  ;;  %v972_v55 = vor.u32 %v971_v12, %v967_v9  ;;  %v1057_v15 = vrot.slane %v3025_v38, 1  ;;  %v2813_v49 = vld [vmem:[%s2971_s14 + $0xd8] sm:$0xff]  }
  0x6c   : > { %v1112_v38 = vrot.slane %v3043_v53, 1 }
  0x6d   : > { %v761_v14 = vsel %vm545_vm0, %v756_v1, %v760_v39  ;;  %v976_v62 = vrot.slane %v974_v45, 1  ;;  %v1060_v45 = vrot.slane %v3048_v56, 1 }
  0x6e   : > { %1012 = vrot.lane.b32.xlu0 %v761_v14, %s2882_s29  ;;  %v2814_v14 = vld [vmem:[%s2971_s14 + $0xc] sm:$0xff]   ;;  %v1113_v39 = vsel %vm1050_vm1, %v1111_v30, %v1112_v38  ;;  %v1067_v30 = vrot.slane %v3098_v42, 1 }
  0x6f   : > { %v977_v4 = vsel %vm545_vm0, %v972_v55, %v976_v62  ;;  %v1114_v62 = vrot.slane %v3052_v60, 1 }
  0x70   : > { %1048 = vrot.lane.b32.xlu1 %v977_v4, %s2882_s29  ;;  %v1115_v4 = vrot.slane %v3070_v13, 1 }
  0x97   : > { %v979_v21 = vpop.permute.xlu0 %978 }
  0x98   : > { %v1161_v22 = vsel %vm1159_vm2, %v2812_v7, %v979_v21  ;;  %v1058_v7 = vrot.slane %v3031_v44, 1  ;;  %v2815_v44 = vld [vmem:[%s2971_s14 + $0xe4] sm:$0xff]   ;;  %v1061_v21 = vrot.slane %v3056_v63, 1 }
  0x99   : > { %1553 = vmatmul.mubr.bf16.vlgmr.msra.gmra.mrb[0].mxu0 %v1161_v22 }
  0x9a   : > { %2594 = vmatprep.mubr.msk.bf16.mxu0 %vm1159_vm2, %v1056_v23  ;;  %v1059_v12 = vsel %vm1050_vm1, %v1057_v15, %v1058_v7  ;;  %v2816_v23 = vld [vmem:[%s2971_s14 + $0x18] sm:$0xff]   ;;  %v1062_v22 = vsel %vm1050_vm1, %v1060_v45, %v1061_v21  ;;  %v1063_v15 = vrot.slane %v3067_v11, 1  ;;  %v1064_v7 = vrot.slane %v3075_v20, 1 }
  0x9b   : > { %v1015_v25 = vpop.permute.xlu0 %1014  ;;  %v981_v29 = vpop.permute.xlu1 %980  ;;  %v1070_v45 = vrot.slane %v3118_v2, 1 }
  0x9c   : > { %v1215_v57 = vsel %vm1159_vm2, %v2813_v49, %v1015_v25  ;;  %v1164_v9 = vsel %vm1159_vm2, %v2814_v14, %v981_v29  ;;  %v2817_v25 = vld [vmem:[%s2971_s14 + $0xf0] sm:$0xff]   ;;  %v1117_v14 = vrot.slane %v3083_v31, 1  ;;  %s137_s14 = sand.u32 1, %s2872_s10  }
  0x9d   : > { %1727 = vmatmul.mubr.bf16.vlgmr.msra.gmra.mrb[0].mxu1 %v1215_v57  ;;  %v1065_v57 = vsel %vm1050_vm1, %v1063_v15, %v1064_v7  ;;  %v1076_v15 = vrot.slane %v3164_v0, 1  ;;  %s2494_s21 = sshll.u32 %s137_s14, 9 }
  0x9e   : > { %2612 = vmatprep.mubr.msk.bf16.mxu1 %vm1159_vm2, %v1110_v33  ;;  %v1116_v33 = vsel %vm1050_vm1, %v1114_v62, %v1115_v4  ;;  %v1073_v62 = vrot.slane %v3144_v36, 1  ;;  %s4010_s22 = scalar_lea.vmem [#allocation2], %s2494_s21 }
  0x9f   : > { %v1017_v55 = vpop.permute.xlu1 %1016  ;;  %v983_v1 = vpop.permute.xlu0 %982  ;;  %s2428_s23 = sshll.u32 %s4010_s22, 4  ;;  %s4283_s23 = int_to_ptr.vmem [resolvable:$true] %s2428_s23 }
  0xa0   : > { %v1218_v27 = vsel %vm1159_vm2, %v2815_v44, %v1017_v55  ;;  %v1167_v48 = vsel %vm1159_vm2, %v2816_v23, %v983_v1  ;;  %s2818_s27 = scalar_lea.vmem %s4283_s23, 8192  ;;  %p2825_p0 = scmp.lt.s32.totalorder %s4283_s23, %s2823_s30 }
  0xa1   : > { %1561 = vmatmul.mubr.bf16.gmra.mrb[4].mxu0 %v1164_v9  ;;  %v1118_v9 = vrot.slane %v3087_v32, 1  ;;  %p2819_p11 = scmp.ne.s32.totalorder %s4283_s23, %s2818_s27  ;;  %p2826_p1 = scmp.lt.s32.totalorder %s2824_s3, %s2818_s27 }
  0xa2   : > { %2595 = vmatprep.mubr.msk.bf16.mxu0 %vm1159_vm2, %v1059_v12 }
  0xa3   : > { %v1019_v53 = vpop.permute.xlu1 %1018  ;;  %v985_v63 = vpop.permute.xlu0 %984  ;;  %v1119_v12 = vsel %vm1050_vm1, %v1117_v14, %v1118_v9  ;;  %v1079_v9 = vrot.slane %v3186_v37, 1  ;;  %p2820_p12 = pnand %p2819_p11, %p2939_p5  ;;  %p2827_p2 = por %p2826_p1, %p2825_p0 }
  0xa4   : > { %v1221_v29 = vsel %vm1159_vm2, %v2817_v25, %v1019_v53  ;;  %v1170_v49 = vsel %vm1159_vm2, %v3048_v56, %v985_v63  ;;  %v1066_v56 = vrot.slane %v3090_v34, 1 }
  0xa5   : > { %1735 = vmatmul.mubr.bf16.gmra.mrb[4].mxu1 %v1218_v27  ;;  %v1121_v27 = vrot.slane %v3109_v52, 1  ;;  %p2821_p13 = pneg %p2820_p12 }
  0xa6   : > { %2613 = vmatprep.mubr.msk.bf16.mxu1 %vm1159_vm2, %v1113_v39  ;;  %v1068_v44 = vsel %vm1050_vm1, %v1066_v56, %v1067_v30 }
  0xa7   : > { %v1021_v13 = vpop.permute.xlu1 %1020  ;;  %v987_v20 = vpop.permute.xlu0 %986  ;;  %p2828_p3 = pnand %p2827_p2, %p2821_p13 }
  0xa8   : > { %v1224_v55 = vsel %vm1159_vm2, %v3052_v60, %v1021_v13  ;;  %v1173_v38 = vsel %vm1159_vm2, %v3067_v11, %v987_v20  ;;  %v1120_v60 = vrot.slane %v3104_v47, 1  ;;  %v1069_v11 = vrot.slane %v3114_v58, 1 }
  0xa9   : > { %1569 = vmatmul.mubr.bf16.gmra.mrb[8].mxu0 %v1167_v48  ;;  %v1124_v48 = vrot.slane %v3131_v18, 1  ;;  %v1130_v13 = vrot.slane %v3175_v17, 1 }
  0xaa   : > { %2596 = vmatprep.mubr.msk.bf16.mxu0 %vm1159_vm2, %v1062_v22  ;;  %v1122_v39 = vsel %vm1050_vm1, %v1120_v60, %v1121_v27  ;;  %v1071_v23 = vsel %vm1050_vm1, %v1069_v11, %v1070_v45  ;;  %v1136_v60 = vrot.slane %v3219_v40, 1 }
  0xab   : > { %v1023_v32 = vpop.permute.xlu1 %1022  ;;  %v989_v42 = vpop.permute.xlu0 %988 }
  0xac   : > { %v1227_v1 = vsel %vm1159_vm2, %v3083_v31, %v1023_v32  ;;  %v1176_v21 = vsel %vm1159_vm2, %v3090_v34, %v989_v42  ;;  %v1123_v31 = vrot.slane %v3124_v10, 1  ;;  %v1072_v34 = vrot.slane %v3136_v24, 1  ;;  %v4427_v42 = vld [vmem:[#allocation5_spill] sm:$0xff] }
  0xad   : > { %1743 = vmatmul.mubr.bf16.gmra.mrb[8].mxu1 %v1221_v29  ;;  %v1127_v29 = vrot.slane %v3158_v54, 1 }
  0xae   : > { %2614 = vmatprep.mubr.msk.bf16.mxu1 %vm1159_vm2, %v1116_v33  ;;  %v1125_v22 = vsel %vm1050_vm1, %v1123_v31, %v1124_v48  ;;  %v1074_v25 = vsel %vm1050_vm1, %v1072_v34, %v1073_v62 }
  0xaf   : > { %v1025_v52 = vpop.permute.xlu1 %1024  ;;  %v991_v2 = vpop.permute.xlu0 %990 }
  0xb0   : > { %v1230_v53 = vsel %vm1159_vm2, %v3104_v47, %v1025_v52  ;;  %v1179_v4 = vsel %vm1159_vm2, %v3114_v58, %v991_v2  ;;  %v1126_v47 = vrot.slane %v3140_v28, 1  ;;  %v1075_v58 = vrot.slane %v3155_v50, 1  ;;  %v4429_v52 = vld [vmem:[#allocation7_spill] sm:$0xff]  ;;  %v4430_v2 = vld [vmem:[#allocation8_spill] sm:$0xff] }
  0xb1   : > { %1579 = vmatmul.mubr.bf16.gmra.mrb[12].mxu0 %v1170_v49 }
  0xb2   : > { %2597 = vmatprep.mubr.msk.bf16.mxu0 %vm1159_vm2, %v1065_v57  ;;  %v1128_v33 = vsel %vm1050_vm1, %v1126_v47, %v1127_v29  ;;  %v1077_v49 = vsel %vm1050_vm1, %v1075_v58, %v1076_v15  ;;  %v4433_v47 = vld [vmem:[#allocation11_spill] sm:$0xff]  ;;  %v4434_v58 = vld [vmem:[#allocation12_spill] sm:$0xff]  ;;  %v4435_v15 = vld [vmem:[#allocation13_spill] sm:$0xff] }
  0xb3   : > { %v1027_v18 = vpop.permute.xlu1 %1026  ;;  %v993_v36 = vpop.permute.xlu0 %992  ;;  %v1142_v29 = vrot.slane %v4433_v47, 1 }
  0xb4   : > { %v1233_v63 = vsel %vm1159_vm2, %v3124_v10, %v1027_v18  ;;  %v1182_v7 = vsel %vm1159_vm2, %v3136_v24, %v993_v36  ;;  %v1129_v10 = vrot.slane %v3171_v16, 1  ;;  %v1078_v24 = vrot.slane %v3178_v19, 1 }
  0xb5   : > { %1753 = vmatmul.mubr.bf16.gmra.mrb[12].mxu1 %v1224_v55 }
  0xb6   : > { %2615 = vmatprep.mubr.msk.bf16.mxu1 %vm1159_vm2, %v1119_v12  ;;  %v1131_v14 = vsel %vm1050_vm1, %v1129_v10, %v1130_v13  ;;  %v1080_v20 = vsel %vm1050_vm1, %v1078_v24, %v1079_v9  ;;  %v1133_v12 = vrot.slane %v3197_v51, 1  ;;  %v4436_v13 = vld [vmem:[#allocation14_spill] sm:$0xff] }
  0xb7   : > { %v1029_v54 = vpop.permute.xlu1 %1028  ;;  %v995_v0 = vpop.permute.xlu0 %994 }
  0xb8   : > { %v1236_v57 = vsel %vm1159_vm2, %v3140_v28, %v1029_v54  ;;  %v1185_v55 = vsel %vm1159_vm2, %v3155_v50, %v995_v0  ;;  %v1132_v28 = vrot.slane %v3192_v43, 1  ;;  %v1081_v50 = vrot.slane %v3202_v61, 1 }
  0xb9   : > { %1589 = vmatmul.mubr.bf16.gmra.mrb[16].mxu0 %v1173_v38  ;;  %v1082_v38 = vrot.slane %v3206_v6, 1  ;;  %v1145_v0 = vrot.slane %v3321_v3, 1 }
  0xba   : > { %2598 = vmatprep.mubr.msk.bf16.mxu0 %vm1159_vm2, %v1068_v44  ;;  %v1134_v30 = vsel %vm1050_vm1, %v1132_v28, %v1133_v12  ;;  %v4437_v12 = vld [vmem:[#allocation15_spill] sm:$0xff] }
  0xbb   : > { %v1031_v17 = vpop.permute.xlu1 %1030  ;;  %v997_v37 = vpop.permute.xlu0 %996  ;;  %v1083_v44 = vsel %vm1050_vm1, %v1081_v50, %v1082_v38 }
  0xbc   : > { %v1239_v56 = vsel %vm1159_vm2, %v3171_v16, %v1031_v17  ;;  %v1188_v32 = vsel %vm1159_vm2, %v3178_v19, %v997_v37  ;;  %v1135_v16 = vrot.slane %v3212_v26, 1  ;;  %v1084_v19 = vrot.slane %v3224_v46, 1  ;;  %v4438_v37 = vld [vmem:[#allocation16_spill] sm:$0xff] }
  0xbd   : > { %1763 = vmatmul.mubr.bf16.gmra.mrb[16].mxu1 %v1227_v1  ;;  %v1094_v17 = vrot.slane %v3334_v41, 1 }
  0xbe   : > { %2616 = vmatprep.mubr.msk.bf16.mxu1 %vm1159_vm2, %v1122_v39  ;;  %v1137_v1 = vsel %vm1050_vm1, %v1135_v16, %v1136_v60  ;;  %v1085_v39 = vrot.slane %v4427_v42, 1 }
  0xbf   : > { %v1033_v51 = vpop.permute.xlu1 %1032  ;;  %v999_v6 = vpop.permute.xlu0 %998 }
  0xc0   : > { %v1242_v27 = vsel %vm1159_vm2, %v3192_v43, %v1033_v51  ;;  %v1191_v11 = vsel %vm1159_vm2, %v3202_v61, %v999_v6  ;;  %v1086_v45 = vsel %vm1050_vm1, %v1084_v19, %v1085_v39  ;;  %v1087_v61 = vrot.slane %v4430_v2, 1  ;;  %v4440_v6 = vld [vmem:[#allocation18_spill] sm:$0xff]  ;;  %v4441_v19 = vld [vmem:[#allocation19_spill] sm:$0xff] }
  0xc1   : > { %1599 = vmatmul.mubr.bf16.gmra.mrb[20].mxu0 %v1176_v21  ;;  %v4428_v21 = vld [vmem:[#allocation6_spill] sm:$0xff]  ;;  %v1151_v42 = vrot.slane %v4441_v19, 1 }
  0xc2   : > { %2599 = vmatprep.mubr.msk.bf16.mxu0 %vm1159_vm2, %v1071_v23  ;;  %v1138_v43 = vrot.slane %v4428_v21, 1  ;;  %v1139_v23 = vrot.slane %v4429_v52, 1 }
  0xc3   : > { %v1035_v40 = vpop.permute.xlu1 %1034  ;;  %v1001_v48 = vpop.permute.xlu0 %1000 }
  0xc4   : > { %v1245_v31 = vsel %vm1159_vm2, %v3212_v26, %v1035_v40  ;;  %v1194_v62 = vsel %vm1159_vm2, %v3224_v46, %v1001_v48  ;;  %v1090_v46 = vrot.slane %v4434_v58, 1  ;;  %v4442_v40 = vld [vmem:[#allocation20_spill] sm:$0xff] }
  0xc5   : > { %1773 = vmatmul.mubr.bf16.gmra.mrb[20].mxu1 %v1230_v53  ;;  %v1140_v53 = vsel %vm1050_vm1, %v1138_v43, %v1139_v23 }
  0xc6   : > { %2617 = vmatprep.mubr.msk.bf16.mxu1 %vm1159_vm2, %v1125_v22  ;;  %v4431_v22 = vld [vmem:[#allocation9_spill] sm:$0xff] }
  0xc7   : > { %v1088_v34 = vrot.slane %v4431_v22, 1  ;;  %v1003_v36 = vpop.permute.xlu0 %1002 }
  0xc8   : > { %v1197_v54 = vsel %vm1159_vm2, %v4430_v2, %v1003_v36  ;;  %v1157_v36 = vrot.slane %v3422_v35, 1 }
  0xc9   : > { %1609 = vmatmul.mubr.bf16.gmra.mrb[24].mxu0 %v1179_v4  ;;  %v1037_v4 = vpop.permute.xlu1 %1036  ;;  %v1089_v18 = vsel %vm1050_vm1, %v1087_v61, %v1088_v34 }
  0xca   : > { %2600 = vmatprep.mubr.msk.bf16.mxu0 %vm1159_vm2, %v1074_v25  ;;  %v4432_v25 = vld [vmem:[#allocation10_spill] sm:$0xff] }
  0xcb   : > { %v1141_v26 = vrot.slane %v4432_v25, 1 }
  0xcd   : > { %1783 = vmatmul.mubr.bf16.gmra.mrb[24].mxu1 %v1233_v63  ;;  %v1248_v63 = vsel %vm1159_vm2, %v4428_v21, %v1037_v4  ;;  %v1005_v24 = vpop.permute.xlu0 %1004 }
  0xce   : > { %2618 = vmatprep.mubr.msk.bf16.mxu1 %vm1159_vm2, %v1128_v33  ;;  %v1143_v33 = vsel %vm1050_vm1, %v1141_v26, %v1142_v29  ;;  %v4447_v29 = vld [vmem:[#allocation25_spill] sm:$0xff] }
  0xd1   : > { %1619 = vmatmul.mubr.bf16.gmra.mrb[28].mxu0 %v1182_v7  ;;  %v1091_v7 = vrot.slane %v4435_v15, 1 }
  0xd2   : > { %2601 = vmatprep.mubr.msk.bf16.mxu0 %vm1159_vm2, %v1077_v49  ;;  %v1039_v49 = vpop.permute.xlu1 %1038  ;;  %v1007_v41 = vpop.permute.xlu0 %1006 }
  0xd3   : > { %v1092_v10 = vsel %vm1050_vm1, %v1090_v46, %v1091_v7  ;;  %v1203_v16 = vsel %vm1159_vm2, %v3331_v5, %v1007_v41 }
  0xd5   : > { %1793 = vmatmul.mubr.bf16.gmra.mrb[28].mxu1 %v1236_v57  ;;  %v1144_v57 = vrot.slane %v4436_v13, 1 }
  0xd6   : > { %2619 = vmatprep.mubr.msk.bf16.mxu1 %vm1159_vm2, %v1131_v14  ;;  %v1251_v14 = vsel %vm1159_vm2, %v4432_v25, %v1039_v49  ;;  %v1041_v3 = vpop.permute.xlu1 %1040 }
  0xd7   : > { %v1146_v9 = vsel %vm1050_vm1, %v1144_v57, %v1145_v0  ;;  %v1254_v50 = vsel %vm1159_vm2, %v4436_v13, %v1041_v3 }
  0xd9   : > { %1629 = vmatmul.mubr.bf16.gmra.mrb[32].mxu0 %v1185_v55  ;;  %v1093_v55 = vrot.slane %v3331_v5, 1  ;;  %v1099_v5 = vrot.slane %v4442_v40, 1 }
  0xda   : > { %2602 = vmatprep.mubr.msk.bf16.mxu0 %vm1159_vm2, %v1080_v20  ;;  %v1200_v20 = vsel %vm1159_vm2, %v4434_v58, %v1005_v24  ;;  %v1043_v60 = vpop.permute.xlu1 %1042 }
  0xdb   : > { %v1095_v28 = vsel %vm1050_vm1, %v1093_v55, %v1094_v17  ;;  %v1257_v39 = vsel %vm1159_vm2, %v4437_v12, %v1043_v60 }
  0xdd   : > { %1803 = vmatmul.mubr.bf16.gmra.mrb[32].mxu1 %v1239_v56  ;;  %v1147_v56 = vrot.slane %v4437_v12, 1 }
  0xde   : > { %2620 = vmatprep.mubr.msk.bf16.mxu1 %vm1159_vm2, %v1134_v30  ;;  %v1148_v30 = vrot.slane %v4438_v37, 1  ;;  %v1045_v52 = vpop.permute.xlu1 %1044 }
  0xdf   : > { %v1260_v61 = vsel %vm1159_vm2, %v4440_v6, %v1045_v52 }
  0xe0   : > { %v1149_v38 = vsel %vm1050_vm1, %v1147_v56, %v1148_v30 }
  0xe1   : > { %1639 = vmatmul.mubr.bf16.gmra.mrb[36].mxu0 %v1188_v32  ;;  %v4439_v32 = vld [vmem:[#allocation17_spill] sm:$0xff] }
  0xe2   : > { %2603 = vmatprep.mubr.msk.bf16.mxu0 %vm1159_vm2, %v1083_v44  ;;  %v1096_v51 = vrot.slane %v4439_v32, 1  ;;  %v1097_v44 = vrot.slane %v3363_v59, 1  ;;  %v1009_v59 = vpop.permute.xlu0 %1008  ;;  %v1047_v26 = vpop.permute.xlu1 %1046 }
  0xe3   : > { %v1206_v43 = vsel %vm1159_vm2, %v4439_v32, %v1009_v59 }
  0xe5   : > { %1813 = vmatmul.mubr.bf16.gmra.mrb[36].mxu1 %v1242_v27  ;;  %v1098_v27 = vsel %vm1050_vm1, %v1096_v51, %v1097_v44 }
  0xe6   : > { %2621 = vmatprep.mubr.msk.bf16.mxu1 %vm1159_vm2, %v1137_v1  ;;  %v1150_v1 = vrot.slane %v4440_v6, 1  ;;  %v1011_v22 = vpop.permute.xlu0 %1010  ;;  %v1049_v15 = vpop.permute.xlu1 %1048 }
  0xe7   : > { %v1209_v25 = vsel %vm1159_vm2, %v4442_v40, %v1011_v22  ;;  %v1266_v35 = vsel %vm1159_vm2, %v4447_v29, %v1049_v15 }
  0xe9   : > { %1649 = vmatmul.mubr.bf16.gmra.mrb[40].mxu0 %v1191_v11  ;;  %v1152_v11 = vsel %vm1050_vm1, %v1150_v1, %v1151_v42 }
  0xea   : > { %2604 = vmatprep.mubr.msk.bf16.mxu0 %vm1159_vm2, %v1086_v45  ;;  %v4443_v45 = vld [vmem:[#allocation22_spill] sm:$0xff] }
  0xeb   : > { %v1100_v21 = vrot.slane %v4443_v45, 1 }
  0xed   : > { %1823 = vmatmul.mubr.bf16.gmra.mrb[40].mxu1 %v1245_v31  ;;  %v1101_v23 = vsel %vm1050_vm1, %v1099_v5, %v1100_v21  ;;  %v4444_v31 = vld [vmem:[#allocation21_spill] sm:$0xff] }
  0xee   : > { %2622 = vmatprep.mubr.msk.bf16.mxu1 %vm1159_vm2, %v1140_v53  ;;  %v1153_v48 = vrot.slane %v4444_v31, 1  ;;  %v4445_v53 = vld [vmem:[#allocation23_spill] sm:$0xff] }
  0xef   : > { %v1154_v2 = vrot.slane %v4445_v53, 1 }
  0xf1   : > { %1659 = vmatmul.mubr.bf16.gmra.mrb[44].mxu0 %v1194_v62  ;;  %v1155_v34 = vsel %vm1050_vm1, %v1153_v48, %v1154_v2  ;;  %v4446_v62 = vld [vmem:[#allocation24_spill] sm:$0xff] }
  0xf2   : > { %2605 = vmatprep.mubr.msk.bf16.mxu0 %vm1159_vm2, %v1089_v18  ;;  %v1102_v4 = vrot.slane %v4446_v62, 1  ;;  %v1103_v18 = vrot.slane %v3416_v8, 1  ;;  %v1013_v8 = vpop.permute.xlu0 %1012 }
  0xf3   : > { %v1212_v46 = vsel %vm1159_vm2, %v4446_v62, %v1013_v8 }
  0xf4   : > { %v1104_v47 = vsel %vm1050_vm1, %v1102_v4, %v1103_v18 }
  0xf5   : > { %1833 = vmatmul.mubr.bf16.gmra.mrb[44].mxu1 %v1248_v63  ;;  %v1156_v63 = vrot.slane %v4447_v29, 1 }
  0xf6   : > { %2623 = vmatprep.mubr.msk.bf16.mxu1 %vm1159_vm2, %v1143_v33  ;;  %v1263_v33 = vsel %vm1159_vm2, %v4444_v31, %v1047_v26 }
  0xf7   : > { %v1158_v58 = vsel %vm1050_vm1, %v1156_v63, %v1157_v36 }
  0xf9   : > { %1669 = vmatmul.mubr.bf16.gmra.mrb[48].mxu0 %v1197_v54 }
  0xfa   : > { %2606 = vmatprep.mubr.msk.bf16.mxu0 %vm1159_vm2, %v1092_v10 }
  0xfd   : > { %1843 = vmatmul.mubr.bf16.gmra.mrb[48].mxu1 %v1251_v14 }
  0xfe   : > { %2624 = vmatprep.mubr.msk.bf16.mxu1 %vm1159_vm2, %v1146_v9 }
 0x101   : > { %1679 = vmatmul.mubr.bf16.gmra.mrb[52].mxu0 %v1200_v20 }
 0x102   : > { %2607 = vmatprep.mubr.msk.bf16.mxu0 %vm1159_vm2, %v1095_v28 }
 0x105   : > { %1853 = vmatmul.mubr.bf16.gmra.mrb[52].mxu1 %v1254_v50 }
 0x106   : > { %2625 = vmatprep.mubr.msk.bf16.mxu1 %vm1159_vm2, %v1149_v38 }
 0x109   : > { %1689 = vmatmul.mubr.bf16.gmra.mrb[56].mxu0 %v1203_v16 }
 0x10a   : > { %2608 = vmatprep.mubr.msk.bf16.mxu0 %vm1159_vm2, %v1098_v27 }
 0x10d   : > { %1863 = vmatmul.mubr.bf16.gmra.mrb[56].mxu1 %v1257_v39 }
 0x10e   : > { %2626 = vmatprep.mubr.msk.bf16.mxu1 %vm1159_vm2, %v1152_v11 }
 0x111   : > { %1699 = vmatmul.mubr.bf16.gmra.mrb[60].mxu0 %v1206_v43 }
 0x112   : > { %2609 = vmatprep.mubr.msk.bf16.mxu0 %vm1159_vm2, %v1101_v23 }
 0x115   : > { %1873 = vmatmul.mubr.bf16.gmra.mrb[60].mxu1 %v1260_v61 }
 0x116   : > { %2627 = vmatprep.mubr.msk.bf16.mxu1 %vm1159_vm2, %v1155_v34 }
 0x119   : > { %1709 = vmatmul.mubr.bf16.gmra.mrb[64].mxu0 %v1209_v25 }
 0x11a   : > { %2610 = vmatprep.mubr.msk.bf16.mxu0 %vm1159_vm2, %v1104_v47 }
 0x11d   : > { %1883 = vmatmul.mubr.bf16.gmra.mrb[64].mxu1 %v1263_v33 }
 0x11e   : > { %2628 = vmatprep.mubr.msk.bf16.mxu1 %vm1159_vm2, %v1158_v58 }
 0x121   : > { %1719 = vmatmul.mubr.bf16.gmra.mrb[68].mxu0 %v1212_v46 }
 0x125   : > { %1893 = vmatmul.mubr.bf16.gmra.mrb[68].mxu1 %v1266_v35 }
 0x16c   : > { %v3639_v7 = vpop.f32.mrb[0].mxu0 }
 0x16d   : > { %v1556_v54 = vpop.f32.mrb[1].mxu0 }
 0x16e   : > { %v3641_v49 = vpop.f32.mrb[2].mxu0 }
 0x16f   : > { %v1559_v10 = vpop.f32.mrb[3].mxu0 }
 0x170   : > { %v3643_v13 = vpop.f32.mrb[0].mxu1 }
 0x171   : > { %v1730_v57 = vpop.f32.mrb[1].mxu1 }
 0x172   : > { %v3645_v0 = vpop.f32.mrb[2].mxu1 }
 0x173   : > { %v1733_v14 = vpop.f32.mrb[3].mxu1 }
 0x174   : > { %v3647_v24 = vpop.f32.mrb[4].mxu0 }
 0x175   : > { %1965 = vrot.lane.b32.xlu0 %v3647_v24, %s2882_s29  ;;  %v1564_v9 = vpop.f32.mrb[5].mxu0 }
 0x176   : > { %v3651_v55 = vpop.f32.mrb[6].mxu0 }
 0x177   : > { %1967 = vrot.lane.b32.xlu1 %v3651_v55, %s2882_s29  ;;  %v1567_v17 = vpop.f32.mrb[7].mxu0 }
 0x178   : > { %v3655_v20 = vpop.f32.mrb[4].mxu1 }
 0x179   : > { %2029 = vrot.lane.b32.xlu0 %v3655_v20, %s2882_s29  ;;  %v1738_v3 = vpop.f32.mrb[5].mxu1 }
 0x17a   : > { %v3659_v28 = vpop.f32.mrb[6].mxu1 }
 0x17b   : > { %2031 = vrot.lane.b32.xlu1 %v3659_v28, %s2882_s29  ;;  %v1741_v12 = vpop.f32.mrb[7].mxu1 }
 0x17c   : > { %v3663_v56 = vpop.f32.mrb[8].mxu0 }
 0x17d   : > { %1969 = vrot.lane.b32.xlu0 %v3663_v56, %s2882_s29  ;;  %v3667_v37 = vpop.f32.mrb[9].mxu0 }
 0x17e   : > { %v3669_v30 = vpop.f32.mrb[10].mxu0 }
 0x17f   : > { %1971 = vrot.lane.b32.xlu1 %v3669_v30, %s2882_s29  ;;  %v3673_v50 = vpop.f32.mrb[11].mxu0 }
 0x180   : > { %v3675_v41 = vpop.f32.mrb[8].mxu1 }
 0x181   : > { %v3677_v38 = vpop.f32.mrb[9].mxu1  ;;  %2033 = vrot.lane.b32.xlu0 %v3675_v41, %s2882_s29 }
 0x182   : > { %v3681_v32 = vpop.f32.mrb[10].mxu1 }
 0x183   : > { %v3683_v51 = vpop.f32.mrb[11].mxu1  ;;  %2035 = vrot.lane.b32.xlu1 %v3681_v32, %s2882_s29 }
 0x184   : > { %v3687_v44 = vpop.f32.mrb[12].mxu0 }
 0x185   : > { %1973 = vrot.lane.b32.xlu0 %v3687_v44, %s2882_s29  ;;  %v3691_v16 = vpop.f32.mrb[13].mxu0 }
 0x186   : > { %v3693_v60 = vpop.f32.mrb[14].mxu0 }
 0x187   : > { %1975 = vrot.lane.b32.xlu1 %v3693_v60, %s2882_s29  ;;  %v3697_v27 = vpop.f32.mrb[15].mxu0 }
 0x188   : > { %v3699_v6 = vpop.f32.mrb[12].mxu1 }
 0x189   : > { %v3701_v1 = vpop.f32.mrb[13].mxu1  ;;  %2037 = vrot.lane.b32.xlu0 %v3699_v6, %s2882_s29 }
 0x18a   : > { %v3705_v19 = vpop.f32.mrb[14].mxu1 }
 0x18b   : > { %v3707_v42 = vpop.f32.mrb[15].mxu1  ;;  %2039 = vrot.lane.b32.xlu1 %v3705_v19, %s2882_s29 }
 0x18c   : > { %v3711_v39 = vpop.f32.mrb[16].mxu0 }
 0x18d   : > { %1977 = vrot.lane.b32.xlu0 %v3711_v39, %s2882_s29  ;;  %v3715_v59 = vpop.f32.mrb[17].mxu0 }
 0x18e   : > { %v3717_v11 = vpop.f32.mrb[18].mxu0 }
 0x18f   : > { %1979 = vrot.lane.b32.xlu1 %v3717_v11, %s2882_s29  ;;  %v3721_v40 = vpop.f32.mrb[19].mxu0 }
 0x190   : > { %v3723_v5 = vpop.f32.mrb[16].mxu1 }
 0x191   : > { %v3725_v45 = vpop.f32.mrb[17].mxu1  ;;  %2041 = vrot.lane.b32.xlu0 %v3723_v5, %s2882_s29 }
 0x192   : > { %v3729_v21 = vpop.f32.mrb[18].mxu1 }
 0x193   : > { %v3731_v43 = vpop.f32.mrb[19].mxu1  ;;  %2043 = vrot.lane.b32.xlu1 %v3729_v21, %s2882_s29 }
 0x194   : > { %v3735_v52 = vpop.f32.mrb[20].mxu0 }
 0x195   : > { %1981 = vrot.lane.b32.xlu0 %v3735_v52, %s2882_s29  ;;  %v3739_v23 = vpop.f32.mrb[21].mxu0 }
 0x196   : > { %v3741_v31 = vpop.f32.mrb[22].mxu0 }
 0x197   : > { %1983 = vrot.lane.b32.xlu1 %v3741_v31, %s2882_s29  ;;  %v3745_v48 = vpop.f32.mrb[23].mxu0 }
 0x198   : > { %v3747_v53 = vpop.f32.mrb[20].mxu1 }
 0x199   : > { %v3749_v2 = vpop.f32.mrb[21].mxu1  ;;  %2045 = vrot.lane.b32.xlu0 %v3747_v53, %s2882_s29 }
 0x19a   : > { %v3753_v61 = vpop.f32.mrb[22].mxu1 }
 0x19b   : > { %v3755_v22 = vpop.f32.mrb[23].mxu1  ;;  %2047 = vrot.lane.b32.xlu1 %v3753_v61, %s2882_s29 }
 0x19c   : > { %v3759_v34 = vpop.f32.mrb[24].mxu0 }
 0x19d   : > { %1985 = vrot.lane.b32.xlu0 %v3759_v34, %s2882_s29  ;;  %v3763_v62 = vpop.f32.mrb[25].mxu0 }
 0x19e   : > { %v3765_v4 = vpop.f32.mrb[26].mxu0 }
 0x19f   : > { %1987 = vrot.lane.b32.xlu1 %v3765_v4, %s2882_s29  ;;  %v3769_v18 = vpop.f32.mrb[27].mxu0 }
 0x1a0   : > { %v3771_v25 = vpop.f32.mrb[24].mxu1 }
 0x1a1   : > { %4448 = vst [vmem:[#allocation5_spill] sm:$0xff] %v3771_v25  ;;  %v3773_v26 = vpop.f32.mrb[25].mxu1  ;;  %2049 = vrot.lane.b32.xlu0 %v3771_v25, %s2882_s29 }
 0x1a2   : > { %v3777_v47 = vpop.f32.mrb[26].mxu1 }
 0x1a3   : > { %4449 = vst [vmem:[#allocation6_spill] sm:$0xff] %v3777_v47  ;;  %v3779_v29 = vpop.f32.mrb[27].mxu1  ;;  %2051 = vrot.lane.b32.xlu1 %v3777_v47, %s2882_s29 }
 0x1a4   : > { %v3783_v63 = vpop.f32.mrb[28].mxu0 }
 0x1a5   : > { %4450 = vst [vmem:[#allocation7_spill] sm:$0xff] %v3783_v63  ;;  %1989 = vrot.lane.b32.xlu0 %v3783_v63, %s2882_s29  ;;  %v3787_v36 = vpop.f32.mrb[29].mxu0 }
 0x1a6   : > { %v3789_v33 = vpop.f32.mrb[30].mxu0 }
 0x1a7   : > { %4451 = vst [vmem:[#allocation8_spill] sm:$0xff] %v3789_v33  ;;  %1991 = vrot.lane.b32.xlu1 %v3789_v33, %s2882_s29  ;;  %v3793_v8 = vpop.f32.mrb[31].mxu0 }
 0x1a8   : > { %v3795_v58 = vpop.f32.mrb[28].mxu1 }
 0x1a9   : > { %4452 = vst [vmem:[#allocation9_spill] sm:$0xff] %v3795_v58  ;;  %v3797_v46 = vpop.f32.mrb[29].mxu1  ;;  %2053 = vrot.lane.b32.xlu0 %v3795_v58, %s2882_s29 }
 0x1aa   : > { %v3801_v15 = vpop.f32.mrb[30].mxu1 }
 0x1ab   : > { %4453 = vst [vmem:[#allocation10_spill] sm:$0xff] %v3801_v15  ;;  %v3803_v35 = vpop.f32.mrb[31].mxu1  ;;  %2055 = vrot.lane.b32.xlu1 %v3801_v15, %s2882_s29 }
 0x1ac   : > { %v3807_v54 = vpop.f32.mrb[32].mxu0 }
 0x1ad   : > { %4454 = vst [vmem:[#allocation11_spill] sm:$0xff] %v3807_v54  ;;  %1993 = vrot.lane.b32.xlu0 %v3807_v54, %s2882_s29  ;;  %v3811_v10 = vpop.f32.mrb[33].mxu0 }
 0x1ae   : > { %v3813_v57 = vpop.f32.mrb[34].mxu0 }
 0x1af   : > { %4455 = vst [vmem:[#allocation12_spill] sm:$0xff] %v3813_v57  ;;  %1995 = vrot.lane.b32.xlu1 %v3813_v57, %s2882_s29  ;;  %v3817_v14 = vpop.f32.mrb[35].mxu0 }
 0x1b0   : > { %v3819_v9 = vpop.f32.mrb[32].mxu1 }
 0x1b1   : > { %4456 = vst [vmem:[#allocation13_spill] sm:$0xff] %v3819_v9  ;;  %v3821_v17 = vpop.f32.mrb[33].mxu1  ;;  %2057 = vrot.lane.b32.xlu0 %v3819_v9, %s2882_s29 }
 0x1b2   : > { %4457 = vst [vmem:[#allocation14_spill] sm:$0xff] %v3821_v17  ;;  %v3825_v3 = vpop.f32.mrb[34].mxu1 }
 0x1b3   : > { %4458 = vst [vmem:[#allocation15_spill] sm:$0xff] %v3825_v3  ;;  %v3827_v12 = vpop.f32.mrb[35].mxu1  ;;  %2059 = vrot.lane.b32.xlu1 %v3825_v3, %s2882_s29 }
 0x1b4   : > { %4459 = vst [vmem:[#allocation16_spill] sm:$0xff] %v3827_v12  ;;  %v3831_v54 = vpop.f32.mrb[36].mxu0 }
 0x1b5   : > { %4460 = vst [vmem:[#allocation17_spill] sm:$0xff] %v3831_v54  ;;  %1997 = vrot.lane.b32.xlu0 %v3831_v54, %s2882_s29  ;;  %v3835_v57 = vpop.f32.mrb[37].mxu0 }
 0x1b6   : > { %4461 = vst [vmem:[#allocation18_spill] sm:$0xff] %v3835_v57  ;;  %v3837_v15 = vpop.f32.mrb[38].mxu0 }
 0x1b7   : > { %4462 = vst [vmem:[#allocation19_spill] sm:$0xff] %v3837_v15  ;;  %1999 = vrot.lane.b32.xlu1 %v3837_v15, %s2882_s29  ;;  %v3841_v9 = vpop.f32.mrb[39].mxu0 }
 0x1b8   : > { %4463 = vst [vmem:[#allocation20_spill] sm:$0xff] %v3841_v9  ;;  %v3843_v58 = vpop.f32.mrb[36].mxu1 }
 0x1b9   : > { %4464 = vst [vmem:[#allocation22_spill] sm:$0xff] %v3843_v58  ;;  %v3845_v33 = vpop.f32.mrb[37].mxu1  ;;  %2061 = vrot.lane.b32.xlu0 %v3843_v58, %s2882_s29 }
 0x1ba   : > { %4465 = vst [vmem:[#allocation21_spill] sm:$0xff] %v3845_v33  ;;  %v3849_v3 = vpop.f32.mrb[38].mxu1 }
 0x1bb   : > { %4466 = vst [vmem:[#allocation23_spill] sm:$0xff] %v3849_v3  ;;  %v3851_v63 = vpop.f32.mrb[39].mxu1  ;;  %2063 = vrot.lane.b32.xlu1 %v3849_v3, %s2882_s29 }
 0x1bc   : > { %4467 = vst [vmem:[#allocation24_spill] sm:$0xff] %v3851_v63  ;;  %v3855_v54 = vpop.f32.mrb[40].mxu0 }
 0x1bd   : > { %4468 = vst [vmem:[#allocation25_spill] sm:$0xff] %v3855_v54  ;;  %2001 = vrot.lane.b32.xlu0 %v3855_v54, %s2882_s29  ;;  %v3859_v15 = vpop.f32.mrb[41].mxu0 }
 0x1be   : > { %4469 = vst [vmem:[#allocation26_spill] sm:$0xff] %v3859_v15  ;;  %v3861_v9 = vpop.f32.mrb[42].mxu0 }
 0x1bf   : > { %4470 = vst [vmem:[#allocation27_spill] sm:$0xff] %v3861_v9  ;;  %2003 = vrot.lane.b32.xlu1 %v3861_v9, %s2882_s29  ;;  %v3865_v58 = vpop.f32.mrb[43].mxu0 }
 0x1c0   : > { %4471 = vst [vmem:[#allocation28_spill] sm:$0xff] %v3865_v58  ;;  %v3867_v33 = vpop.f32.mrb[40].mxu1 }
 0x1c1   : > { %4472 = vst [vmem:[#allocation29_spill] sm:$0xff] %v3867_v33  ;;  %v3869_v63 = vpop.f32.mrb[41].mxu1  ;;  %2065 = vrot.lane.b32.xlu0 %v3867_v33, %s2882_s29 }
 0x1c2   : > { %4473 = vst [vmem:[#allocation30_spill] sm:$0xff] %v3869_v63  ;;  %v3873_v3 = vpop.f32.mrb[42].mxu1 }
 0x1c3   : > { %4474 = vst [vmem:[#allocation31_spill] sm:$0xff] %v3873_v3  ;;  %v3875_v57 = vpop.f32.mrb[43].mxu1  ;;  %2067 = vrot.lane.b32.xlu1 %v3873_v3, %s2882_s29 }
 0x1c4   : > { %4475 = vst [vmem:[#allocation32_spill] sm:$0xff] %v3875_v57  ;;  %v3879_v54 = vpop.f32.mrb[44].mxu0 }
 0x1c5   : > { %4476 = vst [vmem:[#allocation33_spill] sm:$0xff] %v3879_v54  ;;  %2005 = vrot.lane.b32.xlu0 %v3879_v54, %s2882_s29  ;;  %v3883_v9 = vpop.f32.mrb[45].mxu0 }
 0x1c6   : > { %4477 = vst [vmem:[#allocation34_spill] sm:$0xff] %v3883_v9  ;;  %v3885_v58 = vpop.f32.mrb[46].mxu0 }
 0x1c7   : > { %4478 = vst [vmem:[#allocation35_spill] sm:$0xff] %v3885_v58  ;;  %2007 = vrot.lane.b32.xlu1 %v3885_v58, %s2882_s29  ;;  %v3889_v33 = vpop.f32.mrb[47].mxu0 }
 0x1c8   : > { %4479 = vst [vmem:[#allocation36_spill] sm:$0xff] %v3889_v33  ;;  %v3891_v63 = vpop.f32.mrb[44].mxu1 }
 0x1c9   : > { %4480 = vst [vmem:[#allocation37_spill] sm:$0xff] %v3891_v63  ;;  %v3893_v57 = vpop.f32.mrb[45].mxu1  ;;  %2069 = vrot.lane.b32.xlu0 %v3891_v63, %s2882_s29 }
 0x1ca   : > { %4481 = vst [vmem:[#allocation38_spill] sm:$0xff] %v3893_v57  ;;  %v3897_v3 = vpop.f32.mrb[46].mxu1 }
 0x1cb   : > { %4482 = vst [vmem:[#allocation39_spill] sm:$0xff] %v3897_v3  ;;  %v3899_v15 = vpop.f32.mrb[47].mxu1  ;;  %2071 = vrot.lane.b32.xlu1 %v3897_v3, %s2882_s29 }
 0x1cc   : > { %4483 = vst [vmem:[#allocation40_spill] sm:$0xff] %v3899_v15  ;;  %v3903_v54 = vpop.f32.mrb[48].mxu0 }
 0x1cd   : > { %4484 = vst [vmem:[#allocation41_spill] sm:$0xff] %v3903_v54  ;;  %2009 = vrot.lane.b32.xlu0 %v3903_v54, %s2882_s29  ;;  %v3907_v58 = vpop.f32.mrb[49].mxu0 }
 0x1ce   : > { %4485 = vst [vmem:[#allocation42_spill] sm:$0xff] %v3907_v58  ;;  %v3909_v33 = vpop.f32.mrb[50].mxu0 }
 0x1cf   : > { %4486 = vst [vmem:[#allocation43_spill] sm:$0xff] %v3909_v33  ;;  %2011 = vrot.lane.b32.xlu1 %v3909_v33, %s2882_s29  ;;  %v3913_v63 = vpop.f32.mrb[51].mxu0 }
 0x1d0   : > { %4487 = vst [vmem:[#allocation44_spill] sm:$0xff] %v3913_v63  ;;  %v3915_v57 = vpop.f32.mrb[48].mxu1 }
 0x1d1   : > { %4488 = vst [vmem:[#allocation45_spill] sm:$0xff] %v3915_v57  ;;  %v3917_v15 = vpop.f32.mrb[49].mxu1  ;;  %2073 = vrot.lane.b32.xlu0 %v3915_v57, %s2882_s29 }
 0x1d2   : > { %4489 = vst [vmem:[#allocation46_spill] sm:$0xff] %v3917_v15  ;;  %v3921_v3 = vpop.f32.mrb[50].mxu1 }
 0x1d3   : > { %4490 = vst [vmem:[#allocation47_spill] sm:$0xff] %v3921_v3  ;;  %v3923_v9 = vpop.f32.mrb[51].mxu1  ;;  %2075 = vrot.lane.b32.xlu1 %v3921_v3, %s2882_s29 }
 0x1d4   : > { %4491 = vst [vmem:[#allocation48_spill] sm:$0xff] %v3923_v9  ;;  %v3927_v54 = vpop.f32.mrb[52].mxu0 }
 0x1d5   : > { %4492 = vst [vmem:[#allocation49_spill] sm:$0xff] %v3927_v54  ;;  %2013 = vrot.lane.b32.xlu0 %v3927_v54, %s2882_s29  ;;  %v3931_v33 = vpop.f32.mrb[53].mxu0 }
 0x1d6   : > { %4493 = vst [vmem:[#allocation50_spill] sm:$0xff] %v3931_v33  ;;  %v3933_v63 = vpop.f32.mrb[54].mxu0 }
 0x1d7   : > { %4494 = vst [vmem:[#allocation51_spill] sm:$0xff] %v3933_v63  ;;  %2015 = vrot.lane.b32.xlu1 %v3933_v63, %s2882_s29  ;;  %v3937_v57 = vpop.f32.mrb[55].mxu0 }
 0x1d8   : > { %4495 = vst [vmem:[#allocation52_spill] sm:$0xff] %v3937_v57  ;;  %v3939_v15 = vpop.f32.mrb[52].mxu1 }
 0x1d9   : > { %4496 = vst [vmem:[#allocation53_spill] sm:$0xff] %v3939_v15  ;;  %v3941_v9 = vpop.f32.mrb[53].mxu1  ;;  %2077 = vrot.lane.b32.xlu0 %v3939_v15, %s2882_s29 }
 0x1da   : > { %4497 = vst [vmem:[#allocation54_spill] sm:$0xff] %v3941_v9  ;;  %v3945_v3 = vpop.f32.mrb[54].mxu1 }
 0x1db   : > { %4498 = vst [vmem:[#allocation55_spill] sm:$0xff] %v3945_v3  ;;  %v3947_v58 = vpop.f32.mrb[55].mxu1  ;;  %2079 = vrot.lane.b32.xlu1 %v3945_v3, %s2882_s29 }
 0x1dc   : > { %4499 = vst [vmem:[#allocation56_spill] sm:$0xff] %v3947_v58  ;;  %v3951_v54 = vpop.f32.mrb[56].mxu0 }
 0x1dd   : > { %4500 = vst [vmem:[#allocation57_spill] sm:$0xff] %v3951_v54  ;;  %2017 = vrot.lane.b32.xlu0 %v3951_v54, %s2882_s29  ;;  %v3955_v63 = vpop.f32.mrb[57].mxu0 }
 0x1de   : > { %4501 = vst [vmem:[#allocation58_spill] sm:$0xff] %v3955_v63  ;;  %v3957_v57 = vpop.f32.mrb[58].mxu0 }
 0x1df   : > { %4502 = vst [vmem:[#allocation59_spill] sm:$0xff] %v3957_v57  ;;  %2019 = vrot.lane.b32.xlu1 %v3957_v57, %s2882_s29  ;;  %v3961_v15 = vpop.f32.mrb[59].mxu0 }
 0x1e0   : > { %4503 = vst [vmem:[#allocation60_spill] sm:$0xff] %v3961_v15  ;;  %v3963_v58 = vpop.f32.mrb[56].mxu1 }
 0x1e1   : > { %4504 = vst [vmem:[#allocation61_spill] sm:$0xff] %v3963_v58  ;;  %v3965_v9 = vpop.f32.mrb[57].mxu1  ;;  %2081 = vrot.lane.b32.xlu0 %v3963_v58, %s2882_s29 }
 0x1e2   : > { %4505 = vst [vmem:[#allocation62_spill] sm:$0xff] %v3965_v9  ;;  %v3969_v3 = vpop.f32.mrb[58].mxu1 }
 0x1e3   : > { %4506 = vst [vmem:[#allocation63_spill] sm:$0xff] %v3969_v3  ;;  %v3971_v54 = vpop.f32.mrb[59].mxu1  ;;  %2083 = vrot.lane.b32.xlu1 %v3969_v3, %s2882_s29 }
 0x1e4   : > { %4507 = vst [vmem:[#allocation64_spill] sm:$0xff] %v3971_v54  ;;  %v3975_v63 = vpop.f32.mrb[60].mxu0 }
 0x1e5   : > { %4508 = vst [vmem:[#allocation65_spill] sm:$0xff] %v3975_v63  ;;  %2021 = vrot.lane.b32.xlu0 %v3975_v63, %s2882_s29  ;;  %v3979_v57 = vpop.f32.mrb[61].mxu0 }
 0x1e6   : > { %4509 = vst [vmem:[#allocation66_spill] sm:$0xff] %v3979_v57  ;;  %v3982_v15 = vpop.f32.mrb[62].mxu0 }
 0x1e7   : > { %4510 = vst [vmem:[#allocation67_spill] sm:$0xff] %v3982_v15  ;;  %2023 = vrot.lane.b32.xlu1 %v3982_v15, %s2882_s29  ;;  %v3986_v58 = vpop.f32.mrb[63].mxu0  ;;  %v1966_v9 = vpop.permute.xlu0 %1965 }
 0x1e8   : > { %4511 = vst [vmem:[#allocation68_spill] sm:$0xff] %v3986_v58  ;;  %v2157_v3 = vadd.f32 %v1966_v9, %v3639_v7  ;;  %v3991_v54 = vpop.f32.mrb[60].mxu1 }
 0x1e9   : > { %v1968_v33 = vpop.permute.xlu1 %1967  ;;  %v3993_v12 = vpop.f32.mrb[61].mxu1  ;;  %2085 = vrot.lane.b32.xlu0 %v3991_v54, %s2882_s29 }
 0x1ea   : > { %4512 = vst [vmem:[#allocation69_spill] sm:$0xff] %v3993_v12  ;;  %v2221_v63 = vadd.f32 %v2157_v3, %v3667_v37  ;;  %v2158_v57 = vadd.f32 %v1968_v33, %v3641_v49  ;;  %v3999_v15 = vpop.f32.mrb[62].mxu1 }
 0x1eb   : > { %v4001_v58 = vpop.f32.mrb[63].mxu1  ;;  %2087 = vrot.lane.b32.xlu1 %v3999_v15, %s2882_s29  ;;  %v2030_v7 = vpop.permute.xlu0 %2029 }
 0x1ec   : > { %v2285_v9 = vmax.f32 %v2221_v63, 0.0  ;;  %v2222_v47 = vadd.f32 %v2158_v57, %v3673_v50  ;;  %v2189_v12 = vadd.f32 %v2030_v7, %v3643_v13  ;;  %v1710_v17 = vpop.f32.mrb[64].mxu0 }
 0x1ed   : > { %v2032_v25 = vpop.permute.xlu1 %2031  ;;  %2025 = vrot.lane.b32.xlu0 %v1710_v17, %s2882_s29  ;;  %v4008_v37 = vpop.f32.mrb[65].mxu0 }
 0x1ee   : > { %2349 = vst.msk [vmem:[%s4010_s22] sm:$0xff] %vm1159_vm2, %v2285_v9  ;;  %v2286_v49 = vmax.f32 %v2222_v47, 0.0  ;;  %v2253_v63 = vadd.f32 %v2189_v12, %v3677_v38  ;;  %v2190_v50 = vadd.f32 %v2032_v25, %v3645_v0  ;;  %v1714_v33 = vpop.f32.mrb[66].mxu0 }
 0x1ef   : > { %2027 = vrot.lane.b32.xlu1 %v1714_v33, %s2882_s29  ;;  %v4017_v13 = vpop.f32.mrb[67].mxu0  ;;  %v1970_v57 = vpop.permute.xlu0 %1969 }
 0x1f0   : > { %2350 = vst.msk [vmem:[%s4010_s22 + $0x8] sm:$0xff] %vm1159_vm2, %v2286_v49  ;;  %v2317_v17 = vmax.f32 %v2253_v63, 0.0  ;;  %v2254_v3 = vadd.f32 %v2190_v50, %v3683_v51  ;;  %v2159_v7 = vadd.f32 %v1970_v57, %v3647_v24  ;;  %v1884_v9 = vpop.f32.mrb[64].mxu1 }
 0x1f1   : > { %v4023_v47 = vpop.f32.mrb[65].mxu1  ;;  %v1972_v38 = vpop.permute.xlu1 %1971  ;;  %2089 = vrot.lane.b32.xlu0 %v1884_v9, %s2882_s29 }
 0x1f2   : > { %2381 = vst.msk [vmem:[%s4010_s22 + $0x100] sm:$0xff] %vm1159_vm2, %v2317_v17  ;;  %v2318_v0 = vmax.f32 %v2254_v3, 0.0  ;;  %v2223_v25 = vadd.f32 %v2159_v7, %v3691_v16  ;;  %v2160_v12 = vadd.f32 %v1972_v38, %v3651_v55  ;;  %v1888_v49 = vpop.f32.mrb[66].mxu1 }
 0x1f3   : > { %v4030_v63 = vpop.f32.mrb[67].mxu1  ;;  %2091 = vrot.lane.b32.xlu1 %v1888_v49, %s2882_s29  ;;  %v2034_v24 = vpop.permute.xlu0 %2033  ;;  %s2636_s29 = sshll.u32 %s2922_s13, 13  ;;  %s4291_s13 = scalar_lea.sflag [#allocation3], %s137_s14 }
 0x1f4   : > { %2382 = vst.msk [vmem:[%s4010_s22 + $0x108] sm:$0xff] %vm1159_vm2, %v2318_v0  ;;  %v2287_v51 = vmax.f32 %v2223_v25, 0.0  ;;  %v2224_v50 = vadd.f32 %v2160_v12, %v3697_v27  ;;  %v2191_v33 = vadd.f32 %v2034_v24, %v3655_v20  ;;  %v1720_v57 = vpop.f32.mrb[68].mxu0  ;;  %s4281_s26 = scalar_lea.hbm %s4334_s2, %s2636_s29 }
 0x1f5   : > { %v2036_v17 = vpop.permute.xlu1 %2035  ;;  %v4037_v16 = vpop.f32.mrb[69].mxu0 }
 0x1f6   : > { %2351 = vst.msk [vmem:[%s4010_s22 + $0x10] sm:$0xff] %vm1159_vm2, %v2287_v51  ;;  %v2288_v55 = vmax.f32 %v2224_v50, 0.0  ;;  %v2255_v3 = vadd.f32 %v2191_v33, %v3701_v1  ;;  %v2192_v7 = vadd.f32 %v2036_v17, %v3659_v28  ;;  %v1723_v9 = vpop.f32.mrb[70].mxu0 }
 0x1f7   : > { %v1974_v38 = vpop.permute.xlu0 %1973  ;;  %v4043_v0 = vpop.f32.mrb[71].mxu0 }
 0x1f8   : > { %2352 = vst.msk [vmem:[%s4010_s22 + $0x18] sm:$0xff] %vm1159_vm2, %v2288_v55  ;;  %v2319_v20 = vmax.f32 %v2255_v3, 0.0  ;;  %v2256_v27 = vadd.f32 %v2192_v7, %v3707_v42  ;;  %v2161_v25 = vadd.f32 %v1974_v38, %v3663_v56  ;;  %v1894_v12 = vpop.f32.mrb[68].mxu1 }
 0x1f9   : > { %v1976_v49 = vpop.permute.xlu1 %1975  ;;  %v4049_v24 = vpop.f32.mrb[69].mxu1 }
 0x1fa   : > { %2383 = vst.msk [vmem:[%s4010_s22 + $0x110] sm:$0xff] %vm1159_vm2, %v2319_v20  ;;  %v2320_v28 = vmax.f32 %v2256_v27, 0.0  ;;  %v2225_v1 = vadd.f32 %v2161_v25, %v3715_v59  ;;  %v2162_v51 = vadd.f32 %v1976_v49, %v3669_v30  ;;  %v1897_v50 = vpop.f32.mrb[70].mxu1 }
 0x1fb   : > { %v2038_v33 = vpop.permute.xlu0 %2037  ;;  %v4055_v57 = vpop.f32.mrb[71].mxu1 }
 0x1fc   : > { %2384 = vst.msk [vmem:[%s4010_s22 + $0x118] sm:$0xff] %vm1159_vm2, %v2320_v28  ;;  %v2289_v56 = vmax.f32 %v2225_v1, 0.0  ;;  %v2226_v42 = vadd.f32 %v2162_v51, %v3721_v40  ;;  %v2193_v17 = vadd.f32 %v2038_v33, %v3675_v41 }
 0x1fd   : > { %v2040_v55 = vpop.permute.xlu1 %2039 }
 0x1fe   : > { %2353 = vst.msk [vmem:[%s4010_s22 + $0x20] sm:$0xff] %vm1159_vm2, %v2289_v56  ;;  %v2290_v3 = vmax.f32 %v2226_v42, 0.0  ;;  %v2257_v59 = vadd.f32 %v2193_v17, %v3725_v45  ;;  %v2194_v30 = vadd.f32 %v2040_v55, %v3681_v32 }
 0x1ff   : > { %v1978_v7 = vpop.permute.xlu0 %1977 }
 0x200   : > { %2354 = vst.msk [vmem:[%s4010_s22 + $0x28] sm:$0xff] %vm1159_vm2, %v2290_v3  ;;  %v2321_v9 = vmax.f32 %v2257_v59, 0.0  ;;  %v2258_v38 = vadd.f32 %v2194_v30, %v3731_v43  ;;  %v2163_v40 = vadd.f32 %v1978_v7, %v3687_v44 }
 0x201   : > { %v1980_v20 = vpop.permute.xlu1 %1979 }
 0x202   : > { %2385 = vst.msk [vmem:[%s4010_s22 + $0x120] sm:$0xff] %vm1159_vm2, %v2321_v9  ;;  %v2322_v41 = vmax.f32 %v2258_v38, 0.0  ;;  %v2227_v27 = vadd.f32 %v2163_v40, %v3739_v23  ;;  %v2164_v45 = vadd.f32 %v1980_v20, %v3693_v60 }
 0x203   : > { %v2042_v25 = vpop.permute.xlu0 %2041 }
 0x204   : > { %2386 = vst.msk [vmem:[%s4010_s22 + $0x128] sm:$0xff] %vm1159_vm2, %v2322_v41  ;;  %v2291_v32 = vmax.f32 %v2227_v27, 0.0  ;;  %v2228_v12 = vadd.f32 %v2164_v45, %v3745_v48  ;;  %v2195_v43 = vadd.f32 %v2042_v25, %v3699_v6 }
 0x205   : > { %v2044_v49 = vpop.permute.xlu1 %2043 }
 0x206   : > { %2355 = vst.msk [vmem:[%s4010_s22 + $0x30] sm:$0xff] %vm1159_vm2, %v2291_v32  ;;  %v2292_v44 = vmax.f32 %v2228_v12, 0.0  ;;  %v2259_v28 = vadd.f32 %v2195_v43, %v3749_v2  ;;  %v2196_v23 = vadd.f32 %v2044_v49, %v3705_v19  ;;  %v4513_v43 = vld [vmem:[#allocation5_spill] sm:$0xff] }
 0x207   : > { %v1982_v1 = vpop.permute.xlu0 %1981 }
 0x208   : > { %2356 = vst.msk [vmem:[%s4010_s22 + $0x38] sm:$0xff] %vm1159_vm2, %v2292_v44  ;;  %v2323_v60 = vmax.f32 %v2259_v28, 0.0  ;;  %v2260_v51 = vadd.f32 %v2196_v23, %v3755_v22  ;;  %v2165_v48 = vadd.f32 %v1982_v1, %v3711_v39  ;;  %v4514_v44 = vld [vmem:[#allocation14_spill] sm:$0xff] }
 0x209   : > { %v1984_v50 = vpop.permute.xlu1 %1983  ;;  %v4515_v23 = vld [vmem:[#allocation6_spill] sm:$0xff] }
 0x20a   : > { %2387 = vst.msk [vmem:[%s4010_s22 + $0x130] sm:$0xff] %vm1159_vm2, %v2323_v60  ;;  %v2324_v6 = vmax.f32 %v2260_v51, 0.0  ;;  %v2229_v33 = vadd.f32 %v2165_v48, %v3763_v62  ;;  %v2166_v2 = vadd.f32 %v1984_v50, %v3717_v11  ;;  %v4516_v60 = vld [vmem:[#allocation16_spill] sm:$0xff]  ;;  %v4517_v48 = vld [vmem:[#allocation7_spill] sm:$0xff] }
 0x20b   : > { %v2046_v56 = vpop.permute.xlu0 %2045 }
 0x20c   : > { %2388 = vst.msk [vmem:[%s4010_s22 + $0x138] sm:$0xff] %vm1159_vm2, %v2324_v6  ;;  %v2293_v19 = vmax.f32 %v2229_v33, 0.0  ;;  %v2230_v42 = vadd.f32 %v2166_v2, %v3769_v18  ;;  %v2197_v22 = vadd.f32 %v2046_v56, %v3723_v5  ;;  %v4518_v33 = vld [vmem:[#allocation18_spill] sm:$0xff]  ;;  %v4519_v56 = vld [vmem:[#allocation8_spill] sm:$0xff] }
 0x20d   : > { %v2048_v17 = vpop.permute.xlu1 %2047 }
 0x20e   : > { %2357 = vst.msk [vmem:[%s4010_s22 + $0x40] sm:$0xff] %vm1159_vm2, %v2293_v19  ;;  %v2294_v39 = vmax.f32 %v2230_v42, 0.0  ;;  %v2261_v55 = vadd.f32 %v2197_v22, %v3773_v26  ;;  %v2198_v62 = vadd.f32 %v2048_v17, %v3729_v21  ;;  %v4520_v17 = vld [vmem:[#allocation20_spill] sm:$0xff] }
 0x20f   : > { %v1986_v3 = vpop.permute.xlu0 %1985 }
 0x210   : > { %2358 = vst.msk [vmem:[%s4010_s22 + $0x48] sm:$0xff] %vm1159_vm2, %v2294_v39  ;;  %v2325_v11 = vmax.f32 %v2261_v55, 0.0  ;;  %v2262_v59 = vadd.f32 %v2198_v62, %v3779_v29  ;;  %v2167_v18 = vadd.f32 %v1986_v3, %v3735_v52  ;;  %v4521_v55 = vld [vmem:[#allocation9_spill] sm:$0xff] }
 0x211   : > { %v1988_v30 = vpop.permute.xlu1 %1987 }
 0x212   : > { %2389 = vst.msk [vmem:[%s4010_s22 + $0x140] sm:$0xff] %vm1159_vm2, %v2325_v11  ;;  %v2326_v5 = vmax.f32 %v2262_v59, 0.0  ;;  %v2231_v7 = vadd.f32 %v2167_v18, %v3787_v36  ;;  %v2168_v26 = vadd.f32 %v1988_v30, %v3741_v31  ;;  %v4522_v59 = vld [vmem:[#allocation21_spill] sm:$0xff]  ;;  %v4523_v30 = vld [vmem:[#allocation10_spill] sm:$0xff] }
 0x213   : > { %v2050_v9 = vpop.permute.xlu0 %2049 }
 0x214   : > { %2390 = vst.msk [vmem:[%s4010_s22 + $0x148] sm:$0xff] %vm1159_vm2, %v2326_v5  ;;  %v2295_v21 = vmax.f32 %v2231_v7, 0.0  ;;  %v2232_v38 = vadd.f32 %v2168_v26, %v3793_v8  ;;  %v2199_v29 = vadd.f32 %v2050_v9, %v3747_v53  ;;  %v4524_v9 = vld [vmem:[#allocation24_spill] sm:$0xff] }
 0x215   : > { %v2052_v40 = vpop.permute.xlu1 %2051 }
 0x216   : > { %2359 = vst.msk [vmem:[%s4010_s22 + $0x50] sm:$0xff] %vm1159_vm2, %v2295_v21  ;;  %v2296_v52 = vmax.f32 %v2232_v38, 0.0  ;;  %v2263_v20 = vadd.f32 %v2199_v29, %v3797_v46  ;;  %v2200_v36 = vadd.f32 %v2052_v40, %v3753_v61  ;;  %v4525_v38 = vld [vmem:[#allocation11_spill] sm:$0xff] }
 0x217   : > { %v1990_v41 = vpop.permute.xlu0 %1989 }
 0x218   : > { %2360 = vst.msk [vmem:[%s4010_s22 + $0x58] sm:$0xff] %vm1159_vm2, %v2296_v52  ;;  %v2327_v31 = vmax.f32 %v2263_v20, 0.0  ;;  %v2264_v27 = vadd.f32 %v2200_v36, %v3803_v35  ;;  %v2169_v8 = vadd.f32 %v1990_v41, %v3759_v34  ;;  %v4526_v20 = vld [vmem:[#allocation26_spill] sm:$0xff]  ;;  %v4527_v41 = vld [vmem:[#allocation12_spill] sm:$0xff] }
 0x219   : > { %v1992_v45 = vpop.permute.xlu1 %1991 }
 0x21a   : > { %2391 = vst.msk [vmem:[%s4010_s22 + $0x150] sm:$0xff] %vm1159_vm2, %v2327_v31  ;;  %v2328_v53 = vmax.f32 %v2264_v27, 0.0  ;;  %v2233_v25 = vadd.f32 %v2169_v8, %v3811_v10  ;;  %v2170_v46 = vadd.f32 %v1992_v45, %v3765_v4  ;;  %v4528_v45 = vld [vmem:[#allocation28_spill] sm:$0xff] }
 0x21b   : > { %v2054_v32 = vpop.permute.xlu0 %2053 }
 0x21c   : > { %2392 = vst.msk [vmem:[%s4010_s22 + $0x158] sm:$0xff] %vm1159_vm2, %v2328_v53  ;;  %v2297_v61 = vmax.f32 %v2233_v25, 0.0  ;;  %v2234_v12 = vadd.f32 %v2170_v46, %v3817_v14  ;;  %v2201_v35 = vadd.f32 %v2054_v32, %v4513_v43  ;;  %v4529_v25 = vld [vmem:[#allocation13_spill] sm:$0xff] }
 0x21d   : > { %v2056_v49 = vpop.permute.xlu1 %2055 }
 0x21e   : > { %2361 = vst.msk [vmem:[%s4010_s22 + $0x60] sm:$0xff] %vm1159_vm2, %v2297_v61  ;;  %v2298_v34 = vmax.f32 %v2234_v12, 0.0  ;;  %v2265_v28 = vadd.f32 %v2201_v35, %v4514_v44  ;;  %v2202_v10 = vadd.f32 %v2056_v49, %v4515_v23  ;;  %v4530_v12 = vld [vmem:[#allocation30_spill] sm:$0xff]  ;;  %v4531_v35 = vld [vmem:[#allocation15_spill] sm:$0xff] }
 0x21f   : > { %v1994_v1 = vpop.permute.xlu0 %1993 }
 0x220   : > { %2362 = vst.msk [vmem:[%s4010_s22 + $0x68] sm:$0xff] %vm1159_vm2, %v2298_v34  ;;  %v2329_v4 = vmax.f32 %v2265_v28, 0.0  ;;  %v2266_v51 = vadd.f32 %v2202_v10, %v4516_v60  ;;  %v2171_v14 = vadd.f32 %v1994_v1, %v4517_v48  ;;  %v4532_v28 = vld [vmem:[#allocation32_spill] sm:$0xff]  ;;  %v4533_v10 = vld [vmem:[#allocation17_spill] sm:$0xff] }
 0x221   : > { %v1996_v50 = vpop.permute.xlu1 %1995 }
 0x222   : > { %2393 = vst.msk [vmem:[%s4010_s22 + $0x160] sm:$0xff] %vm1159_vm2, %v2329_v4  ;;  %v2330_v6 = vmax.f32 %v2266_v51, 0.0  ;;  %v2235_v2 = vadd.f32 %v2171_v14, %v4518_v33  ;;  %v2172_v19 = vadd.f32 %v1996_v50, %v4519_v56  ;;  %v4534_v51 = vld [vmem:[#allocation34_spill] sm:$0xff]  ;;  %v4535_v14 = vld [vmem:[#allocation19_spill] sm:$0xff] }
 0x223   : > { %v2058_v42 = vpop.permute.xlu0 %2057 }
 0x224   : > { %2394 = vst.msk [vmem:[%s4010_s22 + $0x168] sm:$0xff] %vm1159_vm2, %v2330_v6  ;;  %v2299_v22 = vmax.f32 %v2235_v2, 0.0  ;;  %v2236_v39 = vadd.f32 %v2172_v19, %v4520_v17  ;;  %v2203_v62 = vadd.f32 %v2058_v42, %v4521_v55  ;;  %v4536_v2 = vld [vmem:[#allocation36_spill] sm:$0xff]  ;;  %v4537_v19 = vld [vmem:[#allocation22_spill] sm:$0xff] }
 0x225   : > { %v2060_v3 = vpop.permute.xlu1 %2059 }
 0x226   : > { %2363 = vst.msk [vmem:[%s4010_s22 + $0x70] sm:$0xff] %vm1159_vm2, %v2299_v22  ;;  %v2300_v11 = vmax.f32 %v2236_v39, 0.0  ;;  %v2267_v18 = vadd.f32 %v2203_v62, %v4522_v59  ;;  %v2204_v5 = vadd.f32 %v2060_v3, %v4523_v30  ;;  %v4538_v39 = vld [vmem:[#allocation38_spill] sm:$0xff]  ;;  %v4539_v62 = vld [vmem:[#allocation23_spill] sm:$0xff] }
 0x227   : > { %v1998_v7 = vpop.permute.xlu0 %1997 }
 0x228   : > { %2364 = vst.msk [vmem:[%s4010_s22 + $0x78] sm:$0xff] %vm1159_vm2, %v2300_v11  ;;  %v2331_v26 = vmax.f32 %v2267_v18, 0.0  ;;  %v2268_v21 = vadd.f32 %v2204_v5, %v4524_v9  ;;  %v2173_v29 = vadd.f32 %v1998_v7, %v4525_v38  ;;  %v4540_v18 = vld [vmem:[#allocation40_spill] sm:$0xff]  ;;  %v4541_v5 = vld [vmem:[#allocation25_spill] sm:$0xff] }
 0x229   : > { %v2000_v40 = vpop.permute.xlu1 %1999 }
 0x22a   : > { %2395 = vst.msk [vmem:[%s4010_s22 + $0x170] sm:$0xff] %vm1159_vm2, %v2331_v26  ;;  %v2332_v52 = vmax.f32 %v2268_v21, 0.0  ;;  %v2237_v36 = vadd.f32 %v2173_v29, %v4526_v20  ;;  %v2174_v31 = vadd.f32 %v2000_v40, %v4527_v41  ;;  %v4542_v21 = vld [vmem:[#allocation42_spill] sm:$0xff]  ;;  %v4543_v29 = vld [vmem:[#allocation27_spill] sm:$0xff] }
 0x22b   : > { %v2062_v27 = vpop.permute.xlu0 %2061 }
 0x22c   : > { %2396 = vst.msk [vmem:[%s4010_s22 + $0x178] sm:$0xff] %vm1159_vm2, %v2332_v52  ;;  %v2301_v8 = vmax.f32 %v2237_v36, 0.0  ;;  %v2238_v53 = vadd.f32 %v2174_v31, %v4528_v45  ;;  %v2205_v46 = vadd.f32 %v2062_v27, %v4529_v25  ;;  %v4544_v36 = vld [vmem:[#allocation44_spill] sm:$0xff]  ;;  %v4545_v31 = vld [vmem:[#allocation29_spill] sm:$0xff] }
 0x22d   : > { %v2064_v32 = vpop.permute.xlu1 %2063 }
 0x22e   : > { %2365 = vst.msk [vmem:[%s4010_s22 + $0x80] sm:$0xff] %vm1159_vm2, %v2301_v8  ;;  %v2302_v61 = vmax.f32 %v2238_v53, 0.0  ;;  %v2269_v43 = vadd.f32 %v2205_v46, %v4530_v12  ;;  %v2206_v49 = vadd.f32 %v2064_v32, %v4531_v35  ;;  %v4546_v53 = vld [vmem:[#allocation46_spill] sm:$0xff]  ;;  %v4547_v46 = vld [vmem:[#allocation31_spill] sm:$0xff] }
 0x22f   : > { %v2002_v34 = vpop.permute.xlu0 %2001 }
 0x230   : > { %2366 = vst.msk [vmem:[%s4010_s22 + $0x88] sm:$0xff] %vm1159_vm2, %v2302_v61  ;;  %v2333_v44 = vmax.f32 %v2269_v43, 0.0  ;;  %v2270_v23 = vadd.f32 %v2206_v49, %v4532_v28  ;;  %v2175_v1 = vadd.f32 %v2002_v34, %v4533_v10  ;;  %v4548_v43 = vld [vmem:[#allocation48_spill] sm:$0xff]  ;;  %v4549_v49 = vld [vmem:[#allocation33_spill] sm:$0xff] }
 0x231   : > { %v2004_v4 = vpop.permute.xlu1 %2003 }
 0x232   : > { %2397 = vst.msk [vmem:[%s4010_s22 + $0x180] sm:$0xff] %vm1159_vm2, %v2333_v44  ;;  %v2334_v60 = vmax.f32 %v2270_v23, 0.0  ;;  %v2239_v48 = vadd.f32 %v2175_v1, %v4534_v51  ;;  %v2176_v50 = vadd.f32 %v2004_v4, %v4535_v14  ;;  %v4550_v23 = vld [vmem:[#allocation50_spill] sm:$0xff]  ;;  %v4551_v1 = vld [vmem:[#allocation35_spill] sm:$0xff] }
 0x233   : > { %v2066_v6 = vpop.permute.xlu0 %2065 }
 0x234   : > { %2398 = vst.msk [vmem:[%s4010_s22 + $0x188] sm:$0xff] %vm1159_vm2, %v2334_v60  ;;  %v2303_v33 = vmax.f32 %v2239_v48, 0.0  ;;  %v2240_v56 = vadd.f32 %v2176_v50, %v4536_v2  ;;  %v2207_v42 = vadd.f32 %v2066_v6, %v4537_v19  ;;  %v4552_v48 = vld [vmem:[#allocation52_spill] sm:$0xff]  ;;  %v4553_v50 = vld [vmem:[#allocation37_spill] sm:$0xff] }
 0x235   : > { %v2068_v22 = vpop.permute.xlu1 %2067 }
 0x236   : > { %2367 = vst.msk [vmem:[%s4010_s22 + $0x90] sm:$0xff] %vm1159_vm2, %v2303_v33  ;;  %v2304_v17 = vmax.f32 %v2240_v56, 0.0  ;;  %v2271_v55 = vadd.f32 %v2207_v42, %v4538_v39  ;;  %v2208_v3 = vadd.f32 %v2068_v22, %v4539_v62  ;;  %v4554_v56 = vld [vmem:[#allocation54_spill] sm:$0xff]  ;;  %v4555_v42 = vld [vmem:[#allocation39_spill] sm:$0xff] }
 0x237   : > { %v2006_v11 = vpop.permute.xlu0 %2005 }
 0x238   : > { %2368 = vst.msk [vmem:[%s4010_s22 + $0x98] sm:$0xff] %vm1159_vm2, %v2304_v17  ;;  %v2335_v59 = vmax.f32 %v2271_v55, 0.0  ;;  %v2272_v30 = vadd.f32 %v2208_v3, %v4540_v18  ;;  %v2177_v7 = vadd.f32 %v2006_v11, %v4541_v5  ;;  %v4556_v55 = vld [vmem:[#allocation56_spill] sm:$0xff]  ;;  %v4557_v3 = vld [vmem:[#allocation41_spill] sm:$0xff] }
 0x239   : > { %v2008_v26 = vpop.permute.xlu1 %2007 }
 0x23a   : > { %2399 = vst.msk [vmem:[%s4010_s22 + $0x190] sm:$0xff] %vm1159_vm2, %v2335_v59  ;;  %v2336_v9 = vmax.f32 %v2272_v30, 0.0  ;;  %v2241_v38 = vadd.f32 %v2177_v7, %v4542_v21  ;;  %v2178_v40 = vadd.f32 %v2008_v26, %v4543_v29  ;;  %v4558_v30 = vld [vmem:[#allocation58_spill] sm:$0xff]  ;;  %v4559_v7 = vld [vmem:[#allocation43_spill] sm:$0xff] }
 0x23b   : > { %v2070_v52 = vpop.permute.xlu0 %2069 }
 0x23c   : > { %2400 = vst.msk [vmem:[%s4010_s22 + $0x198] sm:$0xff] %vm1159_vm2, %v2336_v9  ;;  %v2305_v20 = vmax.f32 %v2241_v38, 0.0  ;;  %v2242_v41 = vadd.f32 %v2178_v40, %v4544_v36  ;;  %v2209_v27 = vadd.f32 %v2070_v52, %v4545_v31  ;;  %v4560_v38 = vld [vmem:[#allocation60_spill] sm:$0xff]  ;;  %v4561_v40 = vld [vmem:[#allocation45_spill] sm:$0xff] }
 0x23d   : > { %v2072_v8 = vpop.permute.xlu1 %2071 }
 0x23e   : > { %2369 = vst.msk [vmem:[%s4010_s22 + $0xa0] sm:$0xff] %vm1159_vm2, %v2305_v20  ;;  %v2306_v45 = vmax.f32 %v2242_v41, 0.0  ;;  %v2273_v25 = vadd.f32 %v2209_v27, %v4546_v53  ;;  %v2210_v32 = vadd.f32 %v2072_v8, %v4547_v46  ;;  %v4562_v41 = vld [vmem:[#allocation62_spill] sm:$0xff]  ;;  %v4563_v27 = vld [vmem:[#allocation47_spill] sm:$0xff] }
 0x23f   : > { %v2010_v61 = vpop.permute.xlu0 %2009 }
 0x240   : > { %2370 = vst.msk [vmem:[%s4010_s22 + $0xa8] sm:$0xff] %vm1159_vm2, %v2306_v45  ;;  %v2337_v12 = vmax.f32 %v2273_v25, 0.0  ;;  %v2274_v35 = vadd.f32 %v2210_v32, %v4548_v43  ;;  %v2179_v34 = vadd.f32 %v2010_v61, %v4549_v49  ;;  %v4564_v25 = vld [vmem:[#allocation64_spill] sm:$0xff]  ;;  %v4565_v32 = vld [vmem:[#allocation49_spill] sm:$0xff] }
 0x241   : > { %v2012_v44 = vpop.permute.xlu1 %2011 }
 0x242   : > { %2401 = vst.msk [vmem:[%s4010_s22 + $0x1a0] sm:$0xff] %vm1159_vm2, %v2337_v12  ;;  %v2338_v28 = vmax.f32 %v2274_v35, 0.0  ;;  %v2243_v10 = vadd.f32 %v2179_v34, %v4550_v23  ;;  %v2180_v4 = vadd.f32 %v2012_v44, %v4551_v1  ;;  %v4566_v35 = vld [vmem:[#allocation66_spill] sm:$0xff]  ;;  %v4567_v34 = vld [vmem:[#allocation51_spill] sm:$0xff] }
 0x243   : > { %v2074_v60 = vpop.permute.xlu0 %2073 }
 0x244   : > { %2402 = vst.msk [vmem:[%s4010_s22 + $0x1a8] sm:$0xff] %vm1159_vm2, %v2338_v28  ;;  %v2307_v51 = vmax.f32 %v2243_v10, 0.0  ;;  %v2244_v14 = vadd.f32 %v2180_v4, %v4552_v48  ;;  %v2211_v6 = vadd.f32 %v2074_v60, %v4553_v50  ;;  %v4568_v10 = vld [vmem:[#allocation68_spill] sm:$0xff]  ;;  %v4569_v4 = vld [vmem:[#allocation53_spill] sm:$0xff] }
 0x245   : > { %v2076_v33 = vpop.permute.xlu1 %2075 }
 0x246   : > { %2371 = vst.msk [vmem:[%s4010_s22 + $0xb0] sm:$0xff] %vm1159_vm2, %v2307_v51  ;;  %v2308_v2 = vmax.f32 %v2244_v14, 0.0  ;;  %v2275_v19 = vadd.f32 %v2211_v6, %v4554_v56  ;;  %v2212_v22 = vadd.f32 %v2076_v33, %v4555_v42  ;;  %v4570_v14 = vld [vmem:[#allocation69_spill] sm:$0xff]  ;;  %v4571_v6 = vld [vmem:[#allocation55_spill] sm:$0xff] }
 0x247   : > { %v2014_v17 = vpop.permute.xlu0 %2013  ;;  %v4572_v42 = vld [vmem:[#allocation57_spill] sm:$0xff] }
 0x248   : > { %2372 = vst.msk [vmem:[%s4010_s22 + $0xb8] sm:$0xff] %vm1159_vm2, %v2308_v2  ;;  %v2339_v39 = vmax.f32 %v2275_v19, 0.0  ;;  %v2276_v62 = vadd.f32 %v2212_v22, %v4556_v55  ;;  %v2181_v11 = vadd.f32 %v2014_v17, %v4557_v3 }
 0x249   : > { %v2016_v59 = vpop.permute.xlu1 %2015 }
 0x24a   : > { %2403 = vst.msk [vmem:[%s4010_s22 + $0x1b0] sm:$0xff] %vm1159_vm2, %v2339_v39  ;;  %v2340_v18 = vmax.f32 %v2276_v62, 0.0  ;;  %v2245_v5 = vadd.f32 %v2181_v11, %v4558_v30  ;;  %v2182_v26 = vadd.f32 %v2016_v59, %v4559_v7  ;;  %v4573_v62 = vld [vmem:[#allocation59_spill] sm:$0xff]  ;;  %v4574_v30 = vld [vmem:[#allocation61_spill] sm:$0xff] }
 0x24b   : > { %v2078_v9 = vpop.permute.xlu0 %2077 }
 0x24c   : > { %2404 = vst.msk [vmem:[%s4010_s22 + $0x1b8] sm:$0xff] %vm1159_vm2, %v2340_v18  ;;  %v2309_v21 = vmax.f32 %v2245_v5, 0.0  ;;  %v2246_v29 = vadd.f32 %v2182_v26, %v4560_v38  ;;  %v2213_v52 = vadd.f32 %v2078_v9, %v4561_v40  ;;  %v4575_v9 = vld [vmem:[#allocation63_spill] sm:$0xff]  ;;  %v4576_v40 = vld [vmem:[#allocation65_spill] sm:$0xff] }
 0x24d   : > { %v2080_v20 = vpop.permute.xlu1 %2079 }
 0x24e   : > { %2373 = vst.msk [vmem:[%s4010_s22 + $0xc0] sm:$0xff] %vm1159_vm2, %v2309_v21  ;;  %v2310_v36 = vmax.f32 %v2246_v29, 0.0  ;;  %v2277_v31 = vadd.f32 %v2213_v52, %v4562_v41  ;;  %v2214_v8 = vadd.f32 %v2080_v20, %v4563_v27 }
 0x24f   : > { %v2018_v45 = vpop.permute.xlu0 %2017 }
 0x250   : > { %2374 = vst.msk [vmem:[%s4010_s22 + $0xc8] sm:$0xff] %vm1159_vm2, %v2310_v36  ;;  %v2341_v53 = vmax.f32 %v2277_v31, 0.0  ;;  %v2278_v46 = vadd.f32 %v2214_v8, %v4564_v25  ;;  %v2183_v61 = vadd.f32 %v2018_v45, %v4565_v32  ;;  %v4577_v36 = vld [vmem:[#allocation67_spill] sm:$0xff] }
 0x251   : > { %v2020_v12 = vpop.permute.xlu1 %2019 }
 0x252   : > { %2405 = vst.msk [vmem:[%s4010_s22 + $0x1c0] sm:$0xff] %vm1159_vm2, %v2341_v53  ;;  %v2342_v43 = vmax.f32 %v2278_v46, 0.0  ;;  %v2247_v49 = vadd.f32 %v2183_v61, %v4566_v35  ;;  %v2184_v44 = vadd.f32 %v2020_v12, %v4567_v34 }
 0x253   : > { %v2082_v28 = vpop.permute.xlu0 %2081 }
 0x254   : > { %2406 = vst.msk [vmem:[%s4010_s22 + $0x1c8] sm:$0xff] %vm1159_vm2, %v2342_v43  ;;  %v2311_v23 = vmax.f32 %v2247_v49, 0.0  ;;  %v2248_v1 = vadd.f32 %v2184_v44, %v4568_v10  ;;  %v2215_v60 = vadd.f32 %v2082_v28, %v4569_v4 }
 0x255   : > { %v2084_v51 = vpop.permute.xlu1 %2083 }
 0x256   : > { %2375 = vst.msk [vmem:[%s4010_s22 + $0xd0] sm:$0xff] %vm1159_vm2, %v2311_v23  ;;  %v2312_v48 = vmax.f32 %v2248_v1, 0.0  ;;  %v2279_v50 = vadd.f32 %v2215_v60, %v4570_v14  ;;  %v2216_v33 = vadd.f32 %v2084_v51, %v4571_v6 }
 0x257   : > { %v2022_v2 = vpop.permute.xlu0 %2021 }
 0x258   : > { %2376 = vst.msk [vmem:[%s4010_s22 + $0xd8] sm:$0xff] %vm1159_vm2, %v2312_v48  ;;  %v2343_v56 = vmax.f32 %v2279_v50, 0.0  ;;  %v2280_v19 = vadd.f32 %v2216_v33, %v4001_v58  ;;  %v2185_v22 = vadd.f32 %v2022_v2, %v4572_v42 }
 0x259   : > { %v2024_v17 = vpop.permute.xlu1 %2023 }
 0x25a   : > { %2407 = vst.msk [vmem:[%s4010_s22 + $0x1d0] sm:$0xff] %vm1159_vm2, %v2343_v56  ;;  %v2344_v39 = vmax.f32 %v2280_v19, 0.0  ;;  %v2249_v55 = vadd.f32 %v2185_v22, %v4008_v37  ;;  %v2186_v3 = vadd.f32 %v2024_v17, %v4573_v62 }
 0x25b   : > { %v2086_v11 = vpop.permute.xlu0 %2085 }
 0x25c   : > { %2408 = vst.msk [vmem:[%s4010_s22 + $0x1d8] sm:$0xff] %vm1159_vm2, %v2344_v39  ;;  %v2313_v59 = vmax.f32 %v2249_v55, 0.0  ;;  %v2250_v18 = vadd.f32 %v2186_v3, %v4017_v13  ;;  %v2217_v58 = vadd.f32 %v2086_v11, %v4574_v30 }
 0x25d   : > { %v2088_v5 = vpop.permute.xlu1 %2087 }
 0x25e   : > { %2377 = vst.msk [vmem:[%s4010_s22 + $0xe0] sm:$0xff] %vm1159_vm2, %v2313_v59  ;;  %v2314_v7 = vmax.f32 %v2250_v18, 0.0  ;;  %v2281_v26 = vadd.f32 %v2217_v58, %v4023_v47  ;;  %v2218_v37 = vadd.f32 %v2088_v5, %v4575_v9 }
 0x25f   : > { %v2026_v21 = vpop.permute.xlu0 %2025 }
 0x260   : > { %2378 = vst.msk [vmem:[%s4010_s22 + $0xe8] sm:$0xff] %vm1159_vm2, %v2314_v7  ;;  %v2345_v38 = vmax.f32 %v2281_v26, 0.0  ;;  %v2282_v29 = vadd.f32 %v2218_v37, %v4030_v63  ;;  %v2187_v13 = vadd.f32 %v2026_v21, %v4576_v40 }
 0x261   : > { %v2028_v52 = vpop.permute.xlu1 %2027 }
 0x262   : > { %2409 = vst.msk [vmem:[%s4010_s22 + $0x1e0] sm:$0xff] %vm1159_vm2, %v2345_v38  ;;  %v2346_v20 = vmax.f32 %v2282_v29, 0.0  ;;  %v2188_v47 = vadd.f32 %v2028_v52, %v4577_v36  ;;  %v2251_v41 = vadd.f32 %v2187_v13, %v4037_v16 }
 0x263   : > { %v2090_v31 = vpop.permute.xlu0 %2089 }
 0x264   : > { %2410 = vst.msk [vmem:[%s4010_s22 + $0x1e8] sm:$0xff] %vm1159_vm2, %v2346_v20  ;;  %v2315_v27 = vmax.f32 %v2251_v41, 0.0  ;;  %v2252_v63 = vadd.f32 %v2188_v47, %v4043_v0  ;;  %v2219_v8 = vadd.f32 %v2090_v31, %v3991_v54 }
 0x265   : > { %v2092_v45 = vpop.permute.xlu1 %2091 }
 0x266   : > { %2379 = vst.msk [vmem:[%s4010_s22 + $0xf0] sm:$0xff] %vm1159_vm2, %v2315_v27  ;;  %v2316_v53 = vmax.f32 %v2252_v63, 0.0  ;;  %v2283_v25 = vadd.f32 %v2219_v8, %v4049_v24  ;;  %v2220_v16 = vadd.f32 %v2092_v45, %v3999_v15 }
 0x268   : > { %2380 = vst.msk [vmem:[%s4010_s22 + $0xf8] sm:$0xff] %vm1159_vm2, %v2316_v53  ;;  %v2347_v46 = vmax.f32 %v2283_v25, 0.0  ;;  %v2284_v0 = vadd.f32 %v2220_v16, %v4055_v57 }
 0x26a   : > { %2411 = vst.msk [vmem:[%s4010_s22 + $0x1f0] sm:$0xff] %vm1159_vm2, %v2347_v46  ;;  %v2348_v15 = vmax.f32 %v2284_v0, 0.0 }
 0x26c   : > { %2412 = vst.msk [vmem:[%s4010_s22 + $0x1f8] sm:$0xff] %vm1159_vm2, %v2348_v15 }
 0x26d   : > { %2831 = shalt.err (!%p2828_p3)
}
 0x26e   : > { %s2832_s4 = scalar_lea.hbm %s4281_s26, 8192  ;;  %s2836_s7 = scalar_lea.hbm %s4334_s2, 32768 }
 0x26f   : > { %p2833_p4 = scmp.ne.s32.totalorder %s4281_s26, %s2832_s4  ;;  %p2837_p9 = scmp.lt.u32.totalorder %s4281_s26, %s4334_s2 }
 0x270   : > { %p2838_p10 = scmp.lt.u32.totalorder %s2836_s7, %s2832_s4  ;;  %p2840_p12 = scmp.lt.u32.totalorder %s2832_s4, %s4281_s26 }
 0x271   : > { %p2834_p7 = pnand %p2833_p4, %p2939_p5 }
 0x272   : > { %p2839_p11 = por %p2838_p10, %p2837_p9 }
 0x273   : > { %p2835_p8 = pneg %p2834_p7 }
 0x274   : > { %p2841_p13 = por %p2840_p12, %p2839_p11 }
 0x276   : > { %p2842_p0 = pnand %p2841_p13, %p2835_p8 }
 0x278   : > { %2845 = shalt.err (!%p2842_p0)
}
 0x279   : > { %s2884_s17 = smov 128   ;;  %s2885_s14 = smov 8  }
 0x27a   : > { %2662 = dma.vmem_to_hbm [thread:$0]  (%p2939_p5), %s4283_s23, 8192, %s4281_s26, %s4291_s13, %s2884_s17, %s2884_s17, %s2885_s14  }
 0x27b PF: > { %p2668_p1 = scmp.ge.s32.totalorder %s2880_s12, 2  ;;  %s2443_s21 = sand.u32 1, %s2868_s9  }
 0x27c   : > { %s2444_s22 = scalar_lea.sflag [#allocation3], %s2443_s21 }
 0x27d   : > { %p2665_p2 = pnand %p2668_p1, %p2943_p6 }
 0x27f   : > { %2863 = dma.done.wait (!%p2665_p2), %s2444_s22, 8192  }
 0x280   : > { %2865 = vsyncadd (!%p2665_p2), %s2444_s22, 4294959104  ;;  %p12_p3 = scmp.ge.s32.totalorder %s2926_s15, 6   ;;  %s4578_s9 = smov %s2872_s10 }
 0x281   : > { %s4579_s10 = smov %s2876_s11  ;;  %s4580_s11 = smov %s2937_s18 }
 0x282   : > { %s4581_s12 = smov %s2926_s15  ;;  %14 = sbr.rel (!%p12_p3) target bundleno = 3 (0x3), region = 63 }
 0x289   :  { %2449 = vsyncpa [#allocation3], 1 }
 0x28a   :  { %2451 = vsyncpa [#allocation3 + $0x1], 1 }

</bundles_post_ra>
